<compile_context>
chip_gen: v7x
topology: tpu7x:2x2x1
jax: 0.10.0
libtpu: 0.0.40
codegen_flags: <defaults>
</compile_context>

<pallas_src>
import functools
import math

import jax
import jax.numpy as jnp
from jax import lax
from jax.experimental import pallas as pl
from jax.experimental.pallas import tpu as pltpu


def _round_up(x, m):
    return (x + m - 1) // m * m


def _full_spec(a):
    n = a.ndim
    return pl.BlockSpec(a.shape, lambda *_, _n=n: (0,) * _n)


# -----------------------------------------------------------------------------
# Fused kernel: input-projection GEMMs -> time recurrence -> Linear+log_softmax
# -----------------------------------------------------------------------------
def _bilstm_tagger_kernel(x_ref, wih_f_ref, wih_b_ref, b_f_ref, b_b_ref,
                          whh_f_ref, whh_b_ref, wfc_f_ref, wfc_b_ref, b_fc_ref,
                          out_ref,
                          xg_f, xg_b, hf_all, hb_all,
                          *, T, B, H, unroll):
    """x_ref: (T*B, E) bf16, time-major embedded input (batch padded to B).

    Scratch:
      xg_f, xg_b     : (T*B, 4H) f32  gate pre-activations (input proj + bias)
      hf_all, hb_all : (T*B, H)  f32  per-timestep hidden states (fwd / bwd)
    Output:
      out_ref        : (T*B, Cp) f32  log-probabilities (class dim padded to Cp)
    """
    # ---- 1) hoisted input-projection GEMMs (one large MXU matmul per direction)
    x = x_ref[...]                                               # (T*B, E) bf16
    xg_f[...] = (jnp.dot(x, wih_f_ref[...], preferred_element_type=jnp.float32)
                 + b_f_ref[...])
    xg_b[...] = (jnp.dot(x, wih_b_ref[...], preferred_element_type=jnp.float32)
                 + b_b_ref[...])

    whh_f = whh_f_ref[...]                                       # (H, 4H) bf16
    whh_b = whh_b_ref[...]

    def cell(gates, c):
        # PyTorch gate order i, f, g, o ; gate math in f32 (VPU + EUP path).
        i_g = jax.nn.sigmoid(gates[:, 0 * H:1 * H])
        f_g = jax.nn.sigmoid(gates[:, 1 * H:2 * H])
        g_g = jnp.tanh(gates[:, 2 * H:3 * H])
        o_g = jax.nn.sigmoid(gates[:, 3 * H:4 * H])
        c_new = f_g * c + i_g * g_g
        h_new = o_g * jnp.tanh(c_new)
        return h_new, c_new

    # ---- 2) recurrence: only the small h @ W_hh^T GEMM stays on the serial path
    def step(t, carry):
        h_f, c_f, h_b, c_b = carry

        rf = pl.multiple_of(t * B, B)                            # forward: time t
        g_f = xg_f[pl.ds(rf, B), :] + jnp.dot(
            h_f.astype(jnp.bfloat16), whh_f,
            preferred_element_type=jnp.float32)
        h_f, c_f = cell(g_f, c_f)
        hf_all[pl.ds(rf, B), :] = h_f

        rb = pl.multiple_of((T - 1 - t) * B, B)                  # backward: T-1-t
        g_b = xg_b[pl.ds(rb, B), :] + jnp.dot(
            h_b.astype(jnp.bfloat16), whh_b,
            preferred_element_type=jnp.float32)
        h_b, c_b = cell(g_b, c_b)
        hb_all[pl.ds(rb, B), :] = h_b

        return h_f, c_f, h_b, c_b

    zeros = jnp.zeros((B, H), jnp.float32)
    lax.fori_loop(0, T, step, (zeros, zeros, zeros, zeros), unroll=unroll)

    # ---- 3) fused Linear (split fwd/bwd weights -> no concat) + log_softmax
    logits = (jnp.dot(hf_all[...].astype(jnp.bfloat16), wfc_f_ref[...],
                      preferred_element_type=jnp.float32)
              + jnp.dot(hb_all[...].astype(jnp.bfloat16), wfc_b_ref[...],
                        preferred_element_type=jnp.float32)
              + b_fc_ref[...])                                   # (T*B, Cp) f32
    m = jnp.max(logits, axis=-1, keepdims=True)
    z = logits - m
    lse = jnp.log(jnp.sum(jnp.exp(z), axis=-1, keepdims=True))
    out_ref[...] = z - lse


# -----------------------------------------------------------------------------
# Parameters (PyTorch-equivalent shapes, matmul weights stored transposed, bf16)
# -----------------------------------------------------------------------------
def init_params(key, num_classes, num_embeddings, embedding_dim, hidden_size):
    ks = jax.random.split(key, 12)
    H, E, C = hidden_size, embedding_dim, num_classes
    k_lstm = 1.0 / math.sqrt(H)
    k_fc = 1.0 / math.sqrt(2 * H)
    u = lambda k, shape, bound: jax.random.uniform(
        k, shape, jnp.float32, minval=-bound, maxval=bound)
    bf = lambda a: a.astype(jnp.bfloat16)

    return {
        # embedding table ~ N(0, 1) like nn.Embedding default (kept f32)
        "embedding": jax.random.normal(ks[0], (num_embeddings, E), jnp.float32),
        # forward-direction LSTM weights (transposed for x @ W^T), bf16 for MXU
        "wihT_f": bf(u(ks[1], (E, 4 * H), k_lstm)),
        "whhT_f": bf(u(ks[2], (H, 4 * H), k_lstm)),
        "b_f": u(ks[3], (1, 4 * H), k_lstm) + u(ks[4], (1, 4 * H), k_lstm),  # b_ih+b_hh
        # backward-direction LSTM weights
        "wihT_b": bf(u(ks[5], (E, 4 * H), k_lstm)),
        "whhT_b": bf(u(ks[6], (H, 4 * H), k_lstm)),
        "b_b": u(ks[7], (1, 4 * H), k_lstm) + u(ks[8], (1, 4 * H), k_lstm),
        # final linear layer (transposed) + bias
        "w_fcT": bf(u(ks[9], (2 * H, C), k_fc)),
        "b_fc": u(ks[10], (1, C), k_fc),
    }


# -----------------------------------------------------------------------------
# Forward wrapper (embedding gather + padding stay in plain JAX glue)
# -----------------------------------------------------------------------------
@jax.jit
def bilstm_tagger_forward(params, ids):
    """ids: (B, T) int32 token ids -> (B, T, num_classes) log-probabilities."""
    B, T = ids.shape
    E = params["embedding"].shape[-1]
    H = params["whhT_f"].shape[0]
    C = params["b_fc"].shape[-1]
    Bp = _round_up(max(B, 8), 8)         # >= 8 sublanes through the MXU
    Cp = _round_up(max(C, 128), 128)     # lane-dense kernel output

    # Embedding gather, directly in time-major (T, B, E) layout.
    # TODO(synk): gather stays in XLA; a manual-DMA gather kernel only pays off
    #             for very large vocabularies.
    emb = jnp.take(params["embedding"], ids.T, axis=0)           # (T, B, E) f32
    if Bp != B:
        emb = jnp.pad(emb, ((0, 0), (0, Bp - B), (0, 0)))
    x = emb.astype(jnp.bfloat16).reshape(T * Bp, E)              # (T*Bp, E) bf16

    # Split FC weight into fwd/bwd halves (replaces h concat) and pad the class
    # dim to Cp lanes; padded classes get bias -1e30 -> probability ~ 0.
    w_fcT = params["w_fcT"]
    wfc_f = jnp.pad(w_fcT[:H], ((0, 0), (0, Cp - C)))
    wfc_b = jnp.pad(w_fcT[H:], ((0, 0), (0, Cp - C)))
    b_fc = jnp.pad(params["b_fc"], ((0, 0), (0, Cp - C)), constant_values=-1e30)

    inputs = (x, params["wihT_f"], params["wihT_b"], params["b_f"],
              params["b_b"], params["whhT_f"], params["whhT_b"],
              wfc_f, wfc_b, b_fc)

    # VMEM budget: scratch + (double-buffered) inputs/output, conservative.
    scratch_bytes = (2 * T * Bp * 4 * H + 2 * T * Bp * max(H, 128)) * 4
    io_bytes = 2 * sum(a.size * a.dtype.itemsize for a in inputs) \
        + 2 * T * Bp * Cp * 4
    vmem_limit = int(min(max(32 << 20, 2 * (scratch_bytes + io_bytes)), 48 << 20))

    # Full unroll for short sequences (scheduler visibility); partial otherwise.
    unroll = True if T <= 32 else 8

    kernel = functools.partial(_bilstm_tagger_kernel, T=T, B=Bp, H=H,
                               unroll=unroll)
    out = pl.pallas_call(
        kernel,
        out_shape=jax.ShapeDtypeStruct((T * Bp, Cp), jnp.float32),
        grid=(1,),
        in_specs=[_full_spec(a) for a in inputs],
        out_specs=pl.BlockSpec((T * Bp, Cp), lambda *_: (0, 0)),
        scratch_shapes=[
            pltpu.VMEM((T * Bp, 4 * H), jnp.float32),   # xg_f
            pltpu.VMEM((T * Bp, 4 * H), jnp.float32),   # xg_b
            pltpu.VMEM((T * Bp, H), jnp.float32),       # hf_all
            pltpu.VMEM((T * Bp, H), jnp.float32),       # hb_all
        ],
        compiler_params=pltpu.CompilerParams(
            dimension_semantics=("arbitrary",),
            vmem_limit_bytes=vmem_limit),
    )(*inputs)

    # Un-pad and return batch-first (B, T, C); tiny final-tensor ops.
    logp = out.reshape(T, Bp, Cp)[:, :B, :C]
    return jnp.transpose(logp, (1, 0, 2))


# -----------------------------------------------------------------------------
# Pure-JAX reference (same bf16-matmul / f32-math recipe) for validation
# -----------------------------------------------------------------------------
def _reference_forward(params, ids):
    B, T = ids.shape
    H = params["whhT_f"].shape[0]
    emb = jnp.take(params["embedding"], ids, axis=0).astype(jnp.bfloat16)  # (B,T,E)

    def direction(wih, whh, b, reverse):
        xg = jnp.einsum("bte,eg->btg", emb, wih,
                        preferred_element_type=jnp.float32) + b
        xg = jnp.flip(xg, axis=1) if reverse else xg

        def step(carry, g_t):
            h, c = carry
            g = g_t + jnp.dot(h.astype(jnp.bfloat16), whh,
                              preferred_element_type=jnp.float32)
            i = jax.nn.sigmoid(g[:, :H])
            f = jax.nn.sigmoid(g[:, H:2 * H])
            gg = jnp.tanh(g[:, 2 * H:3 * H])
            o = jax.nn.sigmoid(g[:, 3 * H:])
            c = f * c + i * gg
            h = o * jnp.tanh(c)
            return (h, c), h

        h0 = jnp.zeros((B, H), jnp.float32)
        _, hs = lax.scan(step, (h0, h0), jnp.swapaxes(xg, 0, 1))   # (T,B,H)
        hs = jnp.swapaxes(hs, 0, 1)                                # (B,T,H)
        return jnp.flip(hs, axis=1) if reverse else hs

    hf = direction(params["wihT_f"], params["whhT_f"], params["b_f"], False)
    hb = direction(params["wihT_b"], params["whhT_b"], params["b_b"], True)
    h = jnp.concatenate([hf, hb], axis=-1).astype(jnp.bfloat16)
    logits = jnp.einsum("bth,hc->btc", h, params["w_fcT"],
                        preferred_element_type=jnp.float32) + params["b_fc"]
    return jax.nn.log_softmax(logits, axis=-1)


if __name__ == "__main__":
    # Small deterministic example.
    num_classes = 8
    num_embeddings = 50
    embedding_dim = 32
    hidden_size = 32
    batch = 2
    seq_len = 8

    key = jax.random.PRNGKey(0)
    k_params, k_ids = jax.random.split(key)
    params = init_params(k_params, num_classes, num_embeddings,
                         embedding_dim, hidden_size)
    ids = jax.random.randint(k_ids, (batch, seq_len), 0, num_embeddings,
                             dtype=jnp.int32)

    out = bilstm_tagger_forward(params, ids)
    out = jax.block_until_ready(out)

    assert out.shape == (batch, seq_len, num_classes)
    assert bool(jnp.all(jnp.isfinite(out)))
    # log_softmax rows must (numerically) sum to 1 in prob space
    assert jnp.allclose(jnp.exp(out).sum(-1), 1.0, atol=1e-4)
    # match the pure-JAX/XLA reference with the same precision recipe
    ref = _reference_forward(params, ids)
    assert jnp.allclose(out, ref, atol=1e-3, rtol=1e-3), float(
        jnp.max(jnp.abs(out - ref)))
    print("KERNEL_OK")
</pallas_src>

<mosaic_0001>
module attributes {stable_mosaic.version = 11 : i64} {
  func.func @_bilstm_tagger_kernel(%arg0: i32, %arg1: memref<64x32xbf16, #tpu.memory_space<vmem>>, %arg2: memref<32x128xbf16, #tpu.memory_space<vmem>>, %arg3: memref<32x128xbf16, #tpu.memory_space<vmem>>, %arg4: memref<1x128xf32, #tpu.memory_space<vmem>>, %arg5: memref<1x128xf32, #tpu.memory_space<vmem>>, %arg6: memref<32x128xbf16, #tpu.memory_space<vmem>>, %arg7: memref<32x128xbf16, #tpu.memory_space<vmem>>, %arg8: memref<32x128xbf16, #tpu.memory_space<vmem>>, %arg9: memref<32x128xbf16, #tpu.memory_space<vmem>>, %arg10: memref<1x128xf32, #tpu.memory_space<vmem>>, %arg11: memref<64x128xf32, #tpu.memory_space<vmem>>, %arg12: memref<64x128xf32, #tpu.memory_space<vmem>>, %arg13: memref<64x128xf32, #tpu.memory_space<vmem>>, %arg14: memref<64x32xf32, #tpu.memory_space<vmem>>, %arg15: memref<64x32xf32, #tpu.memory_space<vmem>>) attributes {dimension_semantics = [#tpu.dimension_semantics<arbitrary>], iteration_bounds = array<i64: 1>, scalar_prefetch = 0 : i64, scratch_operands = 4 : i64, tpu.core_type = #tpu.core_type<tc>, window_params = [{pipeline_mode = #tpu.pipeline_mode<synchronous>, transform_indices = @transform_0, window_bounds = array<i64: 64, 32>}, {pipeline_mode = #tpu.pipeline_mode<synchronous>, transform_indices = @transform_1, window_bounds = array<i64: 32, 128>}, {pipeline_mode = #tpu.pipeline_mode<synchronous>, transform_indices = @transform_2, window_bounds = array<i64: 32, 128>}, {pipeline_mode = #tpu.pipeline_mode<synchronous>, transform_indices = @transform_3, window_bounds = array<i64: 1, 128>}, {pipeline_mode = #tpu.pipeline_mode<synchronous>, transform_indices = @transform_4, window_bounds = array<i64: 1, 128>}, {pipeline_mode = #tpu.pipeline_mode<synchronous>, transform_indices = @transform_5, window_bounds = array<i64: 32, 128>}, {pipeline_mode = #tpu.pipeline_mode<synchronous>, transform_indices = @transform_6, window_bounds = array<i64: 32, 128>}, {pipeline_mode = #tpu.pipeline_mode<synchronous>, transform_indices = @transform_7, window_bounds = array<i64: 32, 128>}, {pipeline_mode = #tpu.pipeline_mode<synchronous>, transform_indices = @transform_8, window_bounds = array<i64: 32, 128>}, {pipeline_mode = #tpu.pipeline_mode<synchronous>, transform_indices = @transform_9, window_bounds = array<i64: 1, 128>}, {pipeline_mode = #tpu.pipeline_mode<synchronous>, transform_indices = @transform_10, window_bounds = array<i64: 64, 128>}]} {
    %c0 = arith.constant 0 : index
    %c0_0 = arith.constant 0 : index
    %0 = vector.load %arg1[%c0, %c0_0] : memref<64x32xbf16, #tpu.memory_space<vmem>>, vector<64x32xbf16>
    %c0_1 = arith.constant 0 : index
    %c0_2 = arith.constant 0 : index
    %1 = vector.load %arg2[%c0_1, %c0_2] : memref<32x128xbf16, #tpu.memory_space<vmem>>, vector<32x128xbf16>
    %cst = arith.constant dense<0.000000e+00> : vector<64x128xf32>
    %2 = tpu.matmul %0, %1, %cst {dimension_numbers = #tpu.dot_dimension_numbers<[1], [0], [0], [1], [0, 0, 1, 1], [], []>} : vector<64x32xbf16>, vector<32x128xbf16>, vector<64x128xf32> -> vector<64x128xf32>
    %c0_3 = arith.constant 0 : index
    %c0_4 = arith.constant 0 : index
    %3 = vector.load %arg4[%c0_3, %c0_4] : memref<1x128xf32, #tpu.memory_space<vmem>>, vector<1x128xf32>
    %4 = vector.broadcast %3 : vector<1x128xf32> to vector<64x128xf32>
    %5 = arith.addf %2, %4 : vector<64x128xf32>
    %c0_5 = arith.constant 0 : index
    %c0_6 = arith.constant 0 : index
    %6 = vector.load %arg12[%c0_5, %c0_6] : memref<64x128xf32, #tpu.memory_space<vmem>>, vector<64x128xf32>
    tpu.vector_store %arg12[%c0_5, %c0_6], %5 {strides = array<i32>} : memref<64x128xf32, #tpu.memory_space<vmem>>, vector<64x128xf32>,
    %c0_7 = arith.constant 0 : index
    %c0_8 = arith.constant 0 : index
    %7 = vector.load %arg3[%c0_7, %c0_8] : memref<32x128xbf16, #tpu.memory_space<vmem>>, vector<32x128xbf16>
    %cst_9 = arith.constant dense<0.000000e+00> : vector<64x128xf32>
    %8 = tpu.matmul %0, %7, %cst_9 {dimension_numbers = #tpu.dot_dimension_numbers<[1], [0], [0], [1], [0, 0, 1, 1], [], []>} : vector<64x32xbf16>, vector<32x128xbf16>, vector<64x128xf32> -> vector<64x128xf32>
    %c0_10 = arith.constant 0 : index
    %c0_11 = arith.constant 0 : index
    %9 = vector.load %arg5[%c0_10, %c0_11] : memref<1x128xf32, #tpu.memory_space<vmem>>, vector<1x128xf32>
    %10 = vector.broadcast %9 : vector<1x128xf32> to vector<64x128xf32>
    %11 = arith.addf %8, %10 : vector<64x128xf32>
    %c0_12 = arith.constant 0 : index
    %c0_13 = arith.constant 0 : index
    %12 = vector.load %arg13[%c0_12, %c0_13] : memref<64x128xf32, #tpu.memory_space<vmem>>, vector<64x128xf32>
    tpu.vector_store %arg13[%c0_12, %c0_13], %11 {strides = array<i32>} : memref<64x128xf32, #tpu.memory_space<vmem>>, vector<64x128xf32>,
    %c0_14 = arith.constant 0 : index
    %c0_15 = arith.constant 0 : index
    %13 = vector.load %arg6[%c0_14, %c0_15] : memref<32x128xbf16, #tpu.memory_space<vmem>>, vector<32x128xbf16>
    %c0_16 = arith.constant 0 : index
    %c0_17 = arith.constant 0 : index
    %14 = vector.load %arg7[%c0_16, %c0_17] : memref<32x128xbf16, #tpu.memory_space<vmem>>, vector<32x128xbf16>
    %cst_18 = arith.constant 0.000000e+00 : f32
    %15 = vector.broadcast %cst_18 : f32 to vector<8x32xf32>
    %c0_i32 = arith.constant 0 : i32
    %c8_i32 = arith.constant 8 : i32
    %16 = arith.muli %c0_i32, %c8_i32 : i32
    %17 = tpu.assume_multiple %16, 8 : i32
    %18 = arith.index_cast %17 : i32 to index
    %c0_19 = arith.constant 0 : index
    %19 = vector.load %arg12[%18, %c0_19] : memref<64x128xf32, #tpu.memory_space<vmem>>, vector<8x128xf32>
    %20 = arith.truncf %15 : vector<8x32xf32> to vector<8x32xbf16>
    %cst_20 = arith.constant dense<0.000000e+00> : vector<8x128xf32>
    %21 = tpu.matmul %20, %13, %cst_20 {dimension_numbers = #tpu.dot_dimension_numbers<[1], [0], [0], [1], [0, 0, 1, 1], [], []>} : vector<8x32xbf16>, vector<32x128xbf16>, vector<8x128xf32> -> vector<8x128xf32>
    %22 = arith.addf %19, %21 : vector<8x128xf32>
    %23 = vector.extract_strided_slice %22 {offsets = [0, 0], sizes = [8, 32], strides = [1, 1]} : vector<8x128xf32> to vector<8x32xf32>
    %24 = arith.negf %23 : vector<8x32xf32>
    %25 = math.exp %24 : vector<8x32xf32>
    %cst_21 = arith.constant 1.000000e+00 : f32
    %26 = vector.broadcast %cst_21 : f32 to vector<8x32xf32>
    %27 = arith.addf %26, %25 : vector<8x32xf32>
    %28 = arith.divf %26, %27 : vector<8x32xf32>
    %29 = vector.extract_strided_slice %22 {offsets = [0, 32], sizes = [8, 32], strides = [1, 1]} : vector<8x128xf32> to vector<8x32xf32>
    %30 = arith.negf %29 : vector<8x32xf32>
    %31 = math.exp %30 : vector<8x32xf32>
    %cst_22 = arith.constant 1.000000e+00 : f32
    %32 = vector.broadcast %cst_22 : f32 to vector<8x32xf32>
    %33 = arith.addf %32, %31 : vector<8x32xf32>
    %34 = arith.divf %32, %33 : vector<8x32xf32>
    %35 = vector.extract_strided_slice %22 {offsets = [0, 64], sizes = [8, 32], strides = [1, 1]} : vector<8x128xf32> to vector<8x32xf32>
    %36 = math.tanh %35 : vector<8x32xf32>
    %37 = vector.extract_strided_slice %22 {offsets = [0, 96], sizes = [8, 32], strides = [1, 1]} : vector<8x128xf32> to vector<8x32xf32>
    %38 = arith.negf %37 : vector<8x32xf32>
    %39 = math.exp %38 : vector<8x32xf32>
    %cst_23 = arith.constant 1.000000e+00 : f32
    %40 = vector.broadcast %cst_23 : f32 to vector<8x32xf32>
    %41 = arith.addf %40, %39 : vector<8x32xf32>
    %42 = arith.divf %40, %41 : vector<8x32xf32>
    %43 = arith.mulf %34, %15 : vector<8x32xf32>
    %44 = arith.mulf %28, %36 : vector<8x32xf32>
    %45 = arith.addf %43, %44 : vector<8x32xf32>
    %46 = math.tanh %45 : vector<8x32xf32>
    %47 = arith.mulf %42, %46 : vector<8x32xf32>
    %48 = arith.index_cast %17 : i32 to index
    %c0_24 = arith.constant 0 : index
    %49 = vector.load %arg14[%48, %c0_24] : memref<64x32xf32, #tpu.memory_space<vmem>>, vector<8x32xf32>
    tpu.vector_store %arg14[%48, %c0_24], %47 {strides = array<i32>} : memref<64x32xf32, #tpu.memory_space<vmem>>, vector<8x32xf32>,
    %c7_i32 = arith.constant 7 : i32
    %50 = arith.subi %c7_i32, %c0_i32 : i32
    %c8_i32_25 = arith.constant 8 : i32
    %51 = arith.muli %50, %c8_i32_25 : i32
    %52 = tpu.assume_multiple %51, 8 : i32
    %53 = arith.index_cast %52 : i32 to index
    %c0_26 = arith.constant 0 : index
    %54 = vector.load %arg13[%53, %c0_26] : memref<64x128xf32, #tpu.memory_space<vmem>>, vector<8x128xf32>
    %55 = arith.truncf %15 : vector<8x32xf32> to vector<8x32xbf16>
    %cst_27 = arith.constant dense<0.000000e+00> : vector<8x128xf32>
    %56 = tpu.matmul %55, %14, %cst_27 {dimension_numbers = #tpu.dot_dimension_numbers<[1], [0], [0], [1], [0, 0, 1, 1], [], []>} : vector<8x32xbf16>, vector<32x128xbf16>, vector<8x128xf32> -> vector<8x128xf32>
    %57 = arith.addf %54, %56 : vector<8x128xf32>
    %58 = vector.extract_strided_slice %57 {offsets = [0, 0], sizes = [8, 32], strides = [1, 1]} : vector<8x128xf32> to vector<8x32xf32>
    %59 = arith.negf %58 : vector<8x32xf32>
    %60 = math.exp %59 : vector<8x32xf32>
    %cst_28 = arith.constant 1.000000e+00 : f32
    %61 = vector.broadcast %cst_28 : f32 to vector<8x32xf32>
    %62 = arith.addf %61, %60 : vector<8x32xf32>
    %63 = arith.divf %61, %62 : vector<8x32xf32>
    %64 = vector.extract_strided_slice %57 {offsets = [0, 32], sizes = [8, 32], strides = [1, 1]} : vector<8x128xf32> to vector<8x32xf32>
    %65 = arith.negf %64 : vector<8x32xf32>
    %66 = math.exp %65 : vector<8x32xf32>
    %cst_29 = arith.constant 1.000000e+00 : f32
    %67 = vector.broadcast %cst_29 : f32 to vector<8x32xf32>
    %68 = arith.addf %67, %66 : vector<8x32xf32>
    %69 = arith.divf %67, %68 : vector<8x32xf32>
    %70 = vector.extract_strided_slice %57 {offsets = [0, 64], sizes = [8, 32], strides = [1, 1]} : vector<8x128xf32> to vector<8x32xf32>
    %71 = math.tanh %70 : vector<8x32xf32>
    %72 = vector.extract_strided_slice %57 {offsets = [0, 96], sizes = [8, 32], strides = [1, 1]} : vector<8x128xf32> to vector<8x32xf32>
    %73 = arith.negf %72 : vector<8x32xf32>
    %74 = math.exp %73 : vector<8x32xf32>
    %cst_30 = arith.constant 1.000000e+00 : f32
    %75 = vector.broadcast %cst_30 : f32 to vector<8x32xf32>
    %76 = arith.addf %75, %74 : vector<8x32xf32>
    %77 = arith.divf %75, %76 : vector<8x32xf32>
    %78 = arith.mulf %69, %15 : vector<8x32xf32>
    %79 = arith.mulf %63, %71 : vector<8x32xf32>
    %80 = arith.addf %78, %79 : vector<8x32xf32>
    %81 = math.tanh %80 : vector<8x32xf32>
    %82 = arith.mulf %77, %81 : vector<8x32xf32>
    %83 = arith.index_cast %52 : i32 to index
    %c0_31 = arith.constant 0 : index
    %84 = vector.load %arg15[%83, %c0_31] : memref<64x32xf32, #tpu.memory_space<vmem>>, vector<8x32xf32>
    tpu.vector_store %arg15[%83, %c0_31], %82 {strides = array<i32>} : memref<64x32xf32, #tpu.memory_space<vmem>>, vector<8x32xf32>,
    %c1_i32 = arith.constant 1 : i32
    %c8_i32_32 = arith.constant 8 : i32
    %85 = arith.muli %c1_i32, %c8_i32_32 : i32
    %86 = tpu.assume_multiple %85, 8 : i32
    %87 = arith.index_cast %86 : i32 to index
    %c0_33 = arith.constant 0 : index
    %88 = vector.load %arg12[%87, %c0_33] : memref<64x128xf32, #tpu.memory_space<vmem>>, vector<8x128xf32>
    %89 = arith.truncf %47 : vector<8x32xf32> to vector<8x32xbf16>
    %cst_34 = arith.constant dense<0.000000e+00> : vector<8x128xf32>
    %90 = tpu.matmul %89, %13, %cst_34 {dimension_numbers = #tpu.dot_dimension_numbers<[1], [0], [0], [1], [0, 0, 1, 1], [], []>} : vector<8x32xbf16>, vector<32x128xbf16>, vector<8x128xf32> -> vector<8x128xf32>
    %91 = arith.addf %88, %90 : vector<8x128xf32>
    %92 = vector.extract_strided_slice %91 {offsets = [0, 0], sizes = [8, 32], strides = [1, 1]} : vector<8x128xf32> to vector<8x32xf32>
    %93 = arith.negf %92 : vector<8x32xf32>
    %94 = math.exp %93 : vector<8x32xf32>
    %cst_35 = arith.constant 1.000000e+00 : f32
    %95 = vector.broadcast %cst_35 : f32 to vector<8x32xf32>
    %96 = arith.addf %95, %94 : vector<8x32xf32>
    %97 = arith.divf %95, %96 : vector<8x32xf32>
    %98 = vector.extract_strided_slice %91 {offsets = [0, 32], sizes = [8, 32], strides = [1, 1]} : vector<8x128xf32> to vector<8x32xf32>
    %99 = arith.negf %98 : vector<8x32xf32>
    %100 = math.exp %99 : vector<8x32xf32>
    %cst_36 = arith.constant 1.000000e+00 : f32
    %101 = vector.broadcast %cst_36 : f32 to vector<8x32xf32>
    %102 = arith.addf %101, %100 : vector<8x32xf32>
    %103 = arith.divf %101, %102 : vector<8x32xf32>
    %104 = vector.extract_strided_slice %91 {offsets = [0, 64], sizes = [8, 32], strides = [1, 1]} : vector<8x128xf32> to vector<8x32xf32>
    %105 = math.tanh %104 : vector<8x32xf32>
    %106 = vector.extract_strided_slice %91 {offsets = [0, 96], sizes = [8, 32], strides = [1, 1]} : vector<8x128xf32> to vector<8x32xf32>
    %107 = arith.negf %106 : vector<8x32xf32>
    %108 = math.exp %107 : vector<8x32xf32>
    %cst_37 = arith.constant 1.000000e+00 : f32
    %109 = vector.broadcast %cst_37 : f32 to vector<8x32xf32>
    %110 = arith.addf %109, %108 : vector<8x32xf32>
    %111 = arith.divf %109, %110 : vector<8x32xf32>
    %112 = arith.mulf %103, %45 : vector<8x32xf32>
    %113 = arith.mulf %97, %105 : vector<8x32xf32>
    %114 = arith.addf %112, %113 : vector<8x32xf32>
    %115 = math.tanh %114 : vector<8x32xf32>
    %116 = arith.mulf %111, %115 : vector<8x32xf32>
    %117 = arith.index_cast %86 : i32 to index
    %c0_38 = arith.constant 0 : index
    %118 = vector.load %arg14[%117, %c0_38] : memref<64x32xf32, #tpu.memory_space<vmem>>, vector<8x32xf32>
    tpu.vector_store %arg14[%117, %c0_38], %116 {strides = array<i32>} : memref<64x32xf32, #tpu.memory_space<vmem>>, vector<8x32xf32>,
    %c7_i32_39 = arith.constant 7 : i32
    %119 = arith.subi %c7_i32_39, %c1_i32 : i32
    %c8_i32_40 = arith.constant 8 : i32
    %120 = arith.muli %119, %c8_i32_40 : i32
    %121 = tpu.assume_multiple %120, 8 : i32
    %122 = arith.index_cast %121 : i32 to index
    %c0_41 = arith.constant 0 : index
    %123 = vector.load %arg13[%122, %c0_41] : memref<64x128xf32, #tpu.memory_space<vmem>>, vector<8x128xf32>
    %124 = arith.truncf %82 : vector<8x32xf32> to vector<8x32xbf16>
    %cst_42 = arith.constant dense<0.000000e+00> : vector<8x128xf32>
    %125 = tpu.matmul %124, %14, %cst_42 {dimension_numbers = #tpu.dot_dimension_numbers<[1], [0], [0], [1], [0, 0, 1, 1], [], []>} : vector<8x32xbf16>, vector<32x128xbf16>, vector<8x128xf32> -> vector<8x128xf32>
    %126 = arith.addf %123, %125 : vector<8x128xf32>
    %127 = vector.extract_strided_slice %126 {offsets = [0, 0], sizes = [8, 32], strides = [1, 1]} : vector<8x128xf32> to vector<8x32xf32>
    %128 = arith.negf %127 : vector<8x32xf32>
    %129 = math.exp %128 : vector<8x32xf32>
    %cst_43 = arith.constant 1.000000e+00 : f32
    %130 = vector.broadcast %cst_43 : f32 to vector<8x32xf32>
    %131 = arith.addf %130, %129 : vector<8x32xf32>
    %132 = arith.divf %130, %131 : vector<8x32xf32>
    %133 = vector.extract_strided_slice %126 {offsets = [0, 32], sizes = [8, 32], strides = [1, 1]} : vector<8x128xf32> to vector<8x32xf32>
    %134 = arith.negf %133 : vector<8x32xf32>
    %135 = math.exp %134 : vector<8x32xf32>
    %cst_44 = arith.constant 1.000000e+00 : f32
    %136 = vector.broadcast %cst_44 : f32 to vector<8x32xf32>
    %137 = arith.addf %136, %135 : vector<8x32xf32>
    %138 = arith.divf %136, %137 : vector<8x32xf32>
    %139 = vector.extract_strided_slice %126 {offsets = [0, 64], sizes = [8, 32], strides = [1, 1]} : vector<8x128xf32> to vector<8x32xf32>
    %140 = math.tanh %139 : vector<8x32xf32>
    %141 = vector.extract_strided_slice %126 {offsets = [0, 96], sizes = [8, 32], strides = [1, 1]} : vector<8x128xf32> to vector<8x32xf32>
    %142 = arith.negf %141 : vector<8x32xf32>
    %143 = math.exp %142 : vector<8x32xf32>
    %cst_45 = arith.constant 1.000000e+00 : f32
    %144 = vector.broadcast %cst_45 : f32 to vector<8x32xf32>
    %145 = arith.addf %144, %143 : vector<8x32xf32>
    %146 = arith.divf %144, %145 : vector<8x32xf32>
    %147 = arith.mulf %138, %80 : vector<8x32xf32>
    %148 = arith.mulf %132, %140 : vector<8x32xf32>
    %149 = arith.addf %147, %148 : vector<8x32xf32>
    %150 = math.tanh %149 : vector<8x32xf32>
    %151 = arith.mulf %146, %150 : vector<8x32xf32>
    %152 = arith.index_cast %121 : i32 to index
    %c0_46 = arith.constant 0 : index
    %153 = vector.load %arg15[%152, %c0_46] : memref<64x32xf32, #tpu.memory_space<vmem>>, vector<8x32xf32>
    tpu.vector_store %arg15[%152, %c0_46], %151 {strides = array<i32>} : memref<64x32xf32, #tpu.memory_space<vmem>>, vector<8x32xf32>,
    %c2_i32 = arith.constant 2 : i32
    %c8_i32_47 = arith.constant 8 : i32
    %154 = arith.muli %c2_i32, %c8_i32_47 : i32
    %155 = tpu.assume_multiple %154, 8 : i32
    %156 = arith.index_cast %155 : i32 to index
    %c0_48 = arith.constant 0 : index
    %157 = vector.load %arg12[%156, %c0_48] : memref<64x128xf32, #tpu.memory_space<vmem>>, vector<8x128xf32>
    %158 = arith.truncf %116 : vector<8x32xf32> to vector<8x32xbf16>
    %cst_49 = arith.constant dense<0.000000e+00> : vector<8x128xf32>
    %159 = tpu.matmul %158, %13, %cst_49 {dimension_numbers = #tpu.dot_dimension_numbers<[1], [0], [0], [1], [0, 0, 1, 1], [], []>} : vector<8x32xbf16>, vector<32x128xbf16>, vector<8x128xf32> -> vector<8x128xf32>
    %160 = arith.addf %157, %159 : vector<8x128xf32>
    %161 = vector.extract_strided_slice %160 {offsets = [0, 0], sizes = [8, 32], strides = [1, 1]} : vector<8x128xf32> to vector<8x32xf32>
    %162 = arith.negf %161 : vector<8x32xf32>
    %163 = math.exp %162 : vector<8x32xf32>
    %cst_50 = arith.constant 1.000000e+00 : f32
    %164 = vector.broadcast %cst_50 : f32 to vector<8x32xf32>
    %165 = arith.addf %164, %163 : vector<8x32xf32>
    %166 = arith.divf %164, %165 : vector<8x32xf32>
    %167 = vector.extract_strided_slice %160 {offsets = [0, 32], sizes = [8, 32], strides = [1, 1]} : vector<8x128xf32> to vector<8x32xf32>
    %168 = arith.negf %167 : vector<8x32xf32>
    %169 = math.exp %168 : vector<8x32xf32>
    %cst_51 = arith.constant 1.000000e+00 : f32
    %170 = vector.broadcast %cst_51 : f32 to vector<8x32xf32>
    %171 = arith.addf %170, %169 : vector<8x32xf32>
    %172 = arith.divf %170, %171 : vector<8x32xf32>
    %173 = vector.extract_strided_slice %160 {offsets = [0, 64], sizes = [8, 32], strides = [1, 1]} : vector<8x128xf32> to vector<8x32xf32>
    %174 = math.tanh %173 : vector<8x32xf32>
    %175 = vector.extract_strided_slice %160 {offsets = [0, 96], sizes = [8, 32], strides = [1, 1]} : vector<8x128xf32> to vector<8x32xf32>
    %176 = arith.negf %175 : vector<8x32xf32>
    %177 = math.exp %176 : vector<8x32xf32>
    %cst_52 = arith.constant 1.000000e+00 : f32
    %178 = vector.broadcast %cst_52 : f32 to vector<8x32xf32>
    %179 = arith.addf %178, %177 : vector<8x32xf32>
    %180 = arith.divf %178, %179 : vector<8x32xf32>
    %181 = arith.mulf %172, %114 : vector<8x32xf32>
    %182 = arith.mulf %166, %174 : vector<8x32xf32>
    %183 = arith.addf %181, %182 : vector<8x32xf32>
    %184 = math.tanh %183 : vector<8x32xf32>
    %185 = arith.mulf %180, %184 : vector<8x32xf32>
    %186 = arith.index_cast %155 : i32 to index
    %c0_53 = arith.constant 0 : index
    %187 = vector.load %arg14[%186, %c0_53] : memref<64x32xf32, #tpu.memory_space<vmem>>, vector<8x32xf32>
    tpu.vector_store %arg14[%186, %c0_53], %185 {strides = array<i32>} : memref<64x32xf32, #tpu.memory_space<vmem>>, vector<8x32xf32>,
    %c7_i32_54 = arith.constant 7 : i32
    %188 = arith.subi %c7_i32_54, %c2_i32 : i32
    %c8_i32_55 = arith.constant 8 : i32
    %189 = arith.muli %188, %c8_i32_55 : i32
    %190 = tpu.assume_multiple %189, 8 : i32
    %191 = arith.index_cast %190 : i32 to index
    %c0_56 = arith.constant 0 : index
    %192 = vector.load %arg13[%191, %c0_56] : memref<64x128xf32, #tpu.memory_space<vmem>>, vector<8x128xf32>
    %193 = arith.truncf %151 : vector<8x32xf32> to vector<8x32xbf16>
    %cst_57 = arith.constant dense<0.000000e+00> : vector<8x128xf32>
    %194 = tpu.matmul %193, %14, %cst_57 {dimension_numbers = #tpu.dot_dimension_numbers<[1], [0], [0], [1], [0, 0, 1, 1], [], []>} : vector<8x32xbf16>, vector<32x128xbf16>, vector<8x128xf32> -> vector<8x128xf32>
    %195 = arith.addf %192, %194 : vector<8x128xf32>
    %196 = vector.extract_strided_slice %195 {offsets = [0, 0], sizes = [8, 32], strides = [1, 1]} : vector<8x128xf32> to vector<8x32xf32>
    %197 = arith.negf %196 : vector<8x32xf32>
    %198 = math.exp %197 : vector<8x32xf32>
    %cst_58 = arith.constant 1.000000e+00 : f32
    %199 = vector.broadcast %cst_58 : f32 to vector<8x32xf32>
    %200 = arith.addf %199, %198 : vector<8x32xf32>
    %201 = arith.divf %199, %200 : vector<8x32xf32>
    %202 = vector.extract_strided_slice %195 {offsets = [0, 32], sizes = [8, 32], strides = [1, 1]} : vector<8x128xf32> to vector<8x32xf32>
    %203 = arith.negf %202 : vector<8x32xf32>
    %204 = math.exp %203 : vector<8x32xf32>
    %cst_59 = arith.constant 1.000000e+00 : f32
    %205 = vector.broadcast %cst_59 : f32 to vector<8x32xf32>
    %206 = arith.addf %205, %204 : vector<8x32xf32>
    %207 = arith.divf %205, %206 : vector<8x32xf32>
    %208 = vector.extract_strided_slice %195 {offsets = [0, 64], sizes = [8, 32], strides = [1, 1]} : vector<8x128xf32> to vector<8x32xf32>
    %209 = math.tanh %208 : vector<8x32xf32>
    %210 = vector.extract_strided_slice %195 {offsets = [0, 96], sizes = [8, 32], strides = [1, 1]} : vector<8x128xf32> to vector<8x32xf32>
    %211 = arith.negf %210 : vector<8x32xf32>
    %212 = math.exp %211 : vector<8x32xf32>
    %cst_60 = arith.constant 1.000000e+00 : f32
    %213 = vector.broadcast %cst_60 : f32 to vector<8x32xf32>
    %214 = arith.addf %213, %212 : vector<8x32xf32>
    %215 = arith.divf %213, %214 : vector<8x32xf32>
    %216 = arith.mulf %207, %149 : vector<8x32xf32>
    %217 = arith.mulf %201, %209 : vector<8x32xf32>
    %218 = arith.addf %216, %217 : vector<8x32xf32>
    %219 = math.tanh %218 : vector<8x32xf32>
    %220 = arith.mulf %215, %219 : vector<8x32xf32>
    %221 = arith.index_cast %190 : i32 to index
    %c0_61 = arith.constant 0 : index
    %222 = vector.load %arg15[%221, %c0_61] : memref<64x32xf32, #tpu.memory_space<vmem>>, vector<8x32xf32>
    tpu.vector_store %arg15[%221, %c0_61], %220 {strides = array<i32>} : memref<64x32xf32, #tpu.memory_space<vmem>>, vector<8x32xf32>,
    %c3_i32 = arith.constant 3 : i32
    %c8_i32_62 = arith.constant 8 : i32
    %223 = arith.muli %c3_i32, %c8_i32_62 : i32
    %224 = tpu.assume_multiple %223, 8 : i32
    %225 = arith.index_cast %224 : i32 to index
    %c0_63 = arith.constant 0 : index
    %226 = vector.load %arg12[%225, %c0_63] : memref<64x128xf32, #tpu.memory_space<vmem>>, vector<8x128xf32>
    %227 = arith.truncf %185 : vector<8x32xf32> to vector<8x32xbf16>
    %cst_64 = arith.constant dense<0.000000e+00> : vector<8x128xf32>
    %228 = tpu.matmul %227, %13, %cst_64 {dimension_numbers = #tpu.dot_dimension_numbers<[1], [0], [0], [1], [0, 0, 1, 1], [], []>} : vector<8x32xbf16>, vector<32x128xbf16>, vector<8x128xf32> -> vector<8x128xf32>
    %229 = arith.addf %226, %228 : vector<8x128xf32>
    %230 = vector.extract_strided_slice %229 {offsets = [0, 0], sizes = [8, 32], strides = [1, 1]} : vector<8x128xf32> to vector<8x32xf32>
    %231 = arith.negf %230 : vector<8x32xf32>
    %232 = math.exp %231 : vector<8x32xf32>
    %cst_65 = arith.constant 1.000000e+00 : f32
    %233 = vector.broadcast %cst_65 : f32 to vector<8x32xf32>
    %234 = arith.addf %233, %232 : vector<8x32xf32>
    %235 = arith.divf %233, %234 : vector<8x32xf32>
    %236 = vector.extract_strided_slice %229 {offsets = [0, 32], sizes = [8, 32], strides = [1, 1]} : vector<8x128xf32> to vector<8x32xf32>
    %237 = arith.negf %236 : vector<8x32xf32>
    %238 = math.exp %237 : vector<8x32xf32>
    %cst_66 = arith.constant 1.000000e+00 : f32
    %239 = vector.broadcast %cst_66 : f32 to vector<8x32xf32>
    %240 = arith.addf %239, %238 : vector<8x32xf32>
    %241 = arith.divf %239, %240 : vector<8x32xf32>
    %242 = vector.extract_strided_slice %229 {offsets = [0, 64], sizes = [8, 32], strides = [1, 1]} : vector<8x128xf32> to vector<8x32xf32>
    %243 = math.tanh %242 : vector<8x32xf32>
    %244 = vector.extract_strided_slice %229 {offsets = [0, 96], sizes = [8, 32], strides = [1, 1]} : vector<8x128xf32> to vector<8x32xf32>
    %245 = arith.negf %244 : vector<8x32xf32>
    %246 = math.exp %245 : vector<8x32xf32>
    %cst_67 = arith.constant 1.000000e+00 : f32
    %247 = vector.broadcast %cst_67 : f32 to vector<8x32xf32>
    %248 = arith.addf %247, %246 : vector<8x32xf32>
    %249 = arith.divf %247, %248 : vector<8x32xf32>
    %250 = arith.mulf %241, %183 : vector<8x32xf32>
    %251 = arith.mulf %235, %243 : vector<8x32xf32>
    %252 = arith.addf %250, %251 : vector<8x32xf32>
    %253 = math.tanh %252 : vector<8x32xf32>
    %254 = arith.mulf %249, %253 : vector<8x32xf32>
    %255 = arith.index_cast %224 : i32 to index
    %c0_68 = arith.constant 0 : index
    %256 = vector.load %arg14[%255, %c0_68] : memref<64x32xf32, #tpu.memory_space<vmem>>, vector<8x32xf32>
    tpu.vector_store %arg14[%255, %c0_68], %254 {strides = array<i32>} : memref<64x32xf32, #tpu.memory_space<vmem>>, vector<8x32xf32>,
    %c7_i32_69 = arith.constant 7 : i32
    %257 = arith.subi %c7_i32_69, %c3_i32 : i32
    %c8_i32_70 = arith.constant 8 : i32
    %258 = arith.muli %257, %c8_i32_70 : i32
    %259 = tpu.assume_multiple %258, 8 : i32
    %260 = arith.index_cast %259 : i32 to index
    %c0_71 = arith.constant 0 : index
    %261 = vector.load %arg13[%260, %c0_71] : memref<64x128xf32, #tpu.memory_space<vmem>>, vector<8x128xf32>
    %262 = arith.truncf %220 : vector<8x32xf32> to vector<8x32xbf16>
    %cst_72 = arith.constant dense<0.000000e+00> : vector<8x128xf32>
    %263 = tpu.matmul %262, %14, %cst_72 {dimension_numbers = #tpu.dot_dimension_numbers<[1], [0], [0], [1], [0, 0, 1, 1], [], []>} : vector<8x32xbf16>, vector<32x128xbf16>, vector<8x128xf32> -> vector<8x128xf32>
    %264 = arith.addf %261, %263 : vector<8x128xf32>
    %265 = vector.extract_strided_slice %264 {offsets = [0, 0], sizes = [8, 32], strides = [1, 1]} : vector<8x128xf32> to vector<8x32xf32>
    %266 = arith.negf %265 : vector<8x32xf32>
    %267 = math.exp %266 : vector<8x32xf32>
    %cst_73 = arith.constant 1.000000e+00 : f32
    %268 = vector.broadcast %cst_73 : f32 to vector<8x32xf32>
    %269 = arith.addf %268, %267 : vector<8x32xf32>
    %270 = arith.divf %268, %269 : vector<8x32xf32>
    %271 = vector.extract_strided_slice %264 {offsets = [0, 32], sizes = [8, 32], strides = [1, 1]} : vector<8x128xf32> to vector<8x32xf32>
    %272 = arith.negf %271 : vector<8x32xf32>
    %273 = math.exp %272 : vector<8x32xf32>
    %cst_74 = arith.constant 1.000000e+00 : f32
    %274 = vector.broadcast %cst_74 : f32 to vector<8x32xf32>
    %275 = arith.addf %274, %273 : vector<8x32xf32>
    %276 = arith.divf %274, %275 : vector<8x32xf32>
    %277 = vector.extract_strided_slice %264 {offsets = [0, 64], sizes = [8, 32], strides = [1, 1]} : vector<8x128xf32> to vector<8x32xf32>
    %278 = math.tanh %277 : vector<8x32xf32>
    %279 = vector.extract_strided_slice %264 {offsets = [0, 96], sizes = [8, 32], strides = [1, 1]} : vector<8x128xf32> to vector<8x32xf32>
    %280 = arith.negf %279 : vector<8x32xf32>
    %281 = math.exp %280 : vector<8x32xf32>
    %cst_75 = arith.constant 1.000000e+00 : f32
    %282 = vector.broadcast %cst_75 : f32 to vector<8x32xf32>
    %283 = arith.addf %282, %281 : vector<8x32xf32>
    %284 = arith.divf %282, %283 : vector<8x32xf32>
    %285 = arith.mulf %276, %218 : vector<8x32xf32>
    %286 = arith.mulf %270, %278 : vector<8x32xf32>
    %287 = arith.addf %285, %286 : vector<8x32xf32>
    %288 = math.tanh %287 : vector<8x32xf32>
    %289 = arith.mulf %284, %288 : vector<8x32xf32>
    %290 = arith.index_cast %259 : i32 to index
    %c0_76 = arith.constant 0 : index
    %291 = vector.load %arg15[%290, %c0_76] : memref<64x32xf32, #tpu.memory_space<vmem>>, vector<8x32xf32>
    tpu.vector_store %arg15[%290, %c0_76], %289 {strides = array<i32>} : memref<64x32xf32, #tpu.memory_space<vmem>>, vector<8x32xf32>,
    %c4_i32 = arith.constant 4 : i32
    %c8_i32_77 = arith.constant 8 : i32
    %292 = arith.muli %c4_i32, %c8_i32_77 : i32
    %293 = tpu.assume_multiple %292, 8 : i32
    %294 = arith.index_cast %293 : i32 to index
    %c0_78 = arith.constant 0 : index
    %295 = vector.load %arg12[%294, %c0_78] : memref<64x128xf32, #tpu.memory_space<vmem>>, vector<8x128xf32>
    %296 = arith.truncf %254 : vector<8x32xf32> to vector<8x32xbf16>
    %cst_79 = arith.constant dense<0.000000e+00> : vector<8x128xf32>
    %297 = tpu.matmul %296, %13, %cst_79 {dimension_numbers = #tpu.dot_dimension_numbers<[1], [0], [0], [1], [0, 0, 1, 1], [], []>} : vector<8x32xbf16>, vector<32x128xbf16>, vector<8x128xf32> -> vector<8x128xf32>
    %298 = arith.addf %295, %297 : vector<8x128xf32>
    %299 = vector.extract_strided_slice %298 {offsets = [0, 0], sizes = [8, 32], strides = [1, 1]} : vector<8x128xf32> to vector<8x32xf32>
    %300 = arith.negf %299 : vector<8x32xf32>
    %301 = math.exp %300 : vector<8x32xf32>
    %cst_80 = arith.constant 1.000000e+00 : f32
    %302 = vector.broadcast %cst_80 : f32 to vector<8x32xf32>
    %303 = arith.addf %302, %301 : vector<8x32xf32>
    %304 = arith.divf %302, %303 : vector<8x32xf32>
    %305 = vector.extract_strided_slice %298 {offsets = [0, 32], sizes = [8, 32], strides = [1, 1]} : vector<8x128xf32> to vector<8x32xf32>
    %306 = arith.negf %305 : vector<8x32xf32>
    %307 = math.exp %306 : vector<8x32xf32>
    %cst_81 = arith.constant 1.000000e+00 : f32
    %308 = vector.broadcast %cst_81 : f32 to vector<8x32xf32>
    %309 = arith.addf %308, %307 : vector<8x32xf32>
    %310 = arith.divf %308, %309 : vector<8x32xf32>
    %311 = vector.extract_strided_slice %298 {offsets = [0, 64], sizes = [8, 32], strides = [1, 1]} : vector<8x128xf32> to vector<8x32xf32>
    %312 = math.tanh %311 : vector<8x32xf32>
    %313 = vector.extract_strided_slice %298 {offsets = [0, 96], sizes = [8, 32], strides = [1, 1]} : vector<8x128xf32> to vector<8x32xf32>
    %314 = arith.negf %313 : vector<8x32xf32>
    %315 = math.exp %314 : vector<8x32xf32>
    %cst_82 = arith.constant 1.000000e+00 : f32
    %316 = vector.broadcast %cst_82 : f32 to vector<8x32xf32>
    %317 = arith.addf %316, %315 : vector<8x32xf32>
    %318 = arith.divf %316, %317 : vector<8x32xf32>
    %319 = arith.mulf %310, %252 : vector<8x32xf32>
    %320 = arith.mulf %304, %312 : vector<8x32xf32>
    %321 = arith.addf %319, %320 : vector<8x32xf32>
    %322 = math.tanh %321 : vector<8x32xf32>
    %323 = arith.mulf %318, %322 : vector<8x32xf32>
    %324 = arith.index_cast %293 : i32 to index
    %c0_83 = arith.constant 0 : index
    %325 = vector.load %arg14[%324, %c0_83] : memref<64x32xf32, #tpu.memory_space<vmem>>, vector<8x32xf32>
    tpu.vector_store %arg14[%324, %c0_83], %323 {strides = array<i32>} : memref<64x32xf32, #tpu.memory_space<vmem>>, vector<8x32xf32>,
    %c7_i32_84 = arith.constant 7 : i32
    %326 = arith.subi %c7_i32_84, %c4_i32 : i32
    %c8_i32_85 = arith.constant 8 : i32
    %327 = arith.muli %326, %c8_i32_85 : i32
    %328 = tpu.assume_multiple %327, 8 : i32
    %329 = arith.index_cast %328 : i32 to index
    %c0_86 = arith.constant 0 : index
    %330 = vector.load %arg13[%329, %c0_86] : memref<64x128xf32, #tpu.memory_space<vmem>>, vector<8x128xf32>
    %331 = arith.truncf %289 : vector<8x32xf32> to vector<8x32xbf16>
    %cst_87 = arith.constant dense<0.000000e+00> : vector<8x128xf32>
    %332 = tpu.matmul %331, %14, %cst_87 {dimension_numbers = #tpu.dot_dimension_numbers<[1], [0], [0], [1], [0, 0, 1, 1], [], []>} : vector<8x32xbf16>, vector<32x128xbf16>, vector<8x128xf32> -> vector<8x128xf32>
    %333 = arith.addf %330, %332 : vector<8x128xf32>
    %334 = vector.extract_strided_slice %333 {offsets = [0, 0], sizes = [8, 32], strides = [1, 1]} : vector<8x128xf32> to vector<8x32xf32>
    %335 = arith.negf %334 : vector<8x32xf32>
    %336 = math.exp %335 : vector<8x32xf32>
    %cst_88 = arith.constant 1.000000e+00 : f32
    %337 = vector.broadcast %cst_88 : f32 to vector<8x32xf32>
    %338 = arith.addf %337, %336 : vector<8x32xf32>
    %339 = arith.divf %337, %338 : vector<8x32xf32>
    %340 = vector.extract_strided_slice %333 {offsets = [0, 32], sizes = [8, 32], strides = [1, 1]} : vector<8x128xf32> to vector<8x32xf32>
    %341 = arith.negf %340 : vector<8x32xf32>
    %342 = math.exp %341 : vector<8x32xf32>
    %cst_89 = arith.constant 1.000000e+00 : f32
    %343 = vector.broadcast %cst_89 : f32 to vector<8x32xf32>
    %344 = arith.addf %343, %342 : vector<8x32xf32>
    %345 = arith.divf %343, %344 : vector<8x32xf32>
    %346 = vector.extract_strided_slice %333 {offsets = [0, 64], sizes = [8, 32], strides = [1, 1]} : vector<8x128xf32> to vector<8x32xf32>
    %347 = math.tanh %346 : vector<8x32xf32>
    %348 = vector.extract_strided_slice %333 {offsets = [0, 96], sizes = [8, 32], strides = [1, 1]} : vector<8x128xf32> to vector<8x32xf32>
    %349 = arith.negf %348 : vector<8x32xf32>
    %350 = math.exp %349 : vector<8x32xf32>
    %cst_90 = arith.constant 1.000000e+00 : f32
    %351 = vector.broadcast %cst_90 : f32 to vector<8x32xf32>
    %352 = arith.addf %351, %350 : vector<8x32xf32>
    %353 = arith.divf %351, %352 : vector<8x32xf32>
    %354 = arith.mulf %345, %287 : vector<8x32xf32>
    %355 = arith.mulf %339, %347 : vector<8x32xf32>
    %356 = arith.addf %354, %355 : vector<8x32xf32>
    %357 = math.tanh %356 : vector<8x32xf32>
    %358 = arith.mulf %353, %357 : vector<8x32xf32>
    %359 = arith.index_cast %328 : i32 to index
    %c0_91 = arith.constant 0 : index
    %360 = vector.load %arg15[%359, %c0_91] : memref<64x32xf32, #tpu.memory_space<vmem>>, vector<8x32xf32>
    tpu.vector_store %arg15[%359, %c0_91], %358 {strides = array<i32>} : memref<64x32xf32, #tpu.memory_space<vmem>>, vector<8x32xf32>,
    %c5_i32 = arith.constant 5 : i32
    %c8_i32_92 = arith.constant 8 : i32
    %361 = arith.muli %c5_i32, %c8_i32_92 : i32
    %362 = tpu.assume_multiple %361, 8 : i32
    %363 = arith.index_cast %362 : i32 to index
    %c0_93 = arith.constant 0 : index
    %364 = vector.load %arg12[%363, %c0_93] : memref<64x128xf32, #tpu.memory_space<vmem>>, vector<8x128xf32>
    %365 = arith.truncf %323 : vector<8x32xf32> to vector<8x32xbf16>
    %cst_94 = arith.constant dense<0.000000e+00> : vector<8x128xf32>
    %366 = tpu.matmul %365, %13, %cst_94 {dimension_numbers = #tpu.dot_dimension_numbers<[1], [0], [0], [1], [0, 0, 1, 1], [], []>} : vector<8x32xbf16>, vector<32x128xbf16>, vector<8x128xf32> -> vector<8x128xf32>
    %367 = arith.addf %364, %366 : vector<8x128xf32>
    %368 = vector.extract_strided_slice %367 {offsets = [0, 0], sizes = [8, 32], strides = [1, 1]} : vector<8x128xf32> to vector<8x32xf32>
    %369 = arith.negf %368 : vector<8x32xf32>
    %370 = math.exp %369 : vector<8x32xf32>
    %cst_95 = arith.constant 1.000000e+00 : f32
    %371 = vector.broadcast %cst_95 : f32 to vector<8x32xf32>
    %372 = arith.addf %371, %370 : vector<8x32xf32>
    %373 = arith.divf %371, %372 : vector<8x32xf32>
    %374 = vector.extract_strided_slice %367 {offsets = [0, 32], sizes = [8, 32], strides = [1, 1]} : vector<8x128xf32> to vector<8x32xf32>
    %375 = arith.negf %374 : vector<8x32xf32>
    %376 = math.exp %375 : vector<8x32xf32>
    %cst_96 = arith.constant 1.000000e+00 : f32
    %377 = vector.broadcast %cst_96 : f32 to vector<8x32xf32>
    %378 = arith.addf %377, %376 : vector<8x32xf32>
    %379 = arith.divf %377, %378 : vector<8x32xf32>
    %380 = vector.extract_strided_slice %367 {offsets = [0, 64], sizes = [8, 32], strides = [1, 1]} : vector<8x128xf32> to vector<8x32xf32>
    %381 = math.tanh %380 : vector<8x32xf32>
    %382 = vector.extract_strided_slice %367 {offsets = [0, 96], sizes = [8, 32], strides = [1, 1]} : vector<8x128xf32> to vector<8x32xf32>
    %383 = arith.negf %382 : vector<8x32xf32>
    %384 = math.exp %383 : vector<8x32xf32>
    %cst_97 = arith.constant 1.000000e+00 : f32
    %385 = vector.broadcast %cst_97 : f32 to vector<8x32xf32>
    %386 = arith.addf %385, %384 : vector<8x32xf32>
    %387 = arith.divf %385, %386 : vector<8x32xf32>
    %388 = arith.mulf %379, %321 : vector<8x32xf32>
    %389 = arith.mulf %373, %381 : vector<8x32xf32>
    %390 = arith.addf %388, %389 : vector<8x32xf32>
    %391 = math.tanh %390 : vector<8x32xf32>
    %392 = arith.mulf %387, %391 : vector<8x32xf32>
    %393 = arith.index_cast %362 : i32 to index
    %c0_98 = arith.constant 0 : index
    %394 = vector.load %arg14[%393, %c0_98] : memref<64x32xf32, #tpu.memory_space<vmem>>, vector<8x32xf32>
    tpu.vector_store %arg14[%393, %c0_98], %392 {strides = array<i32>} : memref<64x32xf32, #tpu.memory_space<vmem>>, vector<8x32xf32>,
    %c7_i32_99 = arith.constant 7 : i32
    %395 = arith.subi %c7_i32_99, %c5_i32 : i32
    %c8_i32_100 = arith.constant 8 : i32
    %396 = arith.muli %395, %c8_i32_100 : i32
    %397 = tpu.assume_multiple %396, 8 : i32
    %398 = arith.index_cast %397 : i32 to index
    %c0_101 = arith.constant 0 : index
    %399 = vector.load %arg13[%398, %c0_101] : memref<64x128xf32, #tpu.memory_space<vmem>>, vector<8x128xf32>
    %400 = arith.truncf %358 : vector<8x32xf32> to vector<8x32xbf16>
    %cst_102 = arith.constant dense<0.000000e+00> : vector<8x128xf32>
    %401 = tpu.matmul %400, %14, %cst_102 {dimension_numbers = #tpu.dot_dimension_numbers<[1], [0], [0], [1], [0, 0, 1, 1], [], []>} : vector<8x32xbf16>, vector<32x128xbf16>, vector<8x128xf32> -> vector<8x128xf32>
    %402 = arith.addf %399, %401 : vector<8x128xf32>
    %403 = vector.extract_strided_slice %402 {offsets = [0, 0], sizes = [8, 32], strides = [1, 1]} : vector<8x128xf32> to vector<8x32xf32>
    %404 = arith.negf %403 : vector<8x32xf32>
    %405 = math.exp %404 : vector<8x32xf32>
    %cst_103 = arith.constant 1.000000e+00 : f32
    %406 = vector.broadcast %cst_103 : f32 to vector<8x32xf32>
    %407 = arith.addf %406, %405 : vector<8x32xf32>
    %408 = arith.divf %406, %407 : vector<8x32xf32>
    %409 = vector.extract_strided_slice %402 {offsets = [0, 32], sizes = [8, 32], strides = [1, 1]} : vector<8x128xf32> to vector<8x32xf32>
    %410 = arith.negf %409 : vector<8x32xf32>
    %411 = math.exp %410 : vector<8x32xf32>
    %cst_104 = arith.constant 1.000000e+00 : f32
    %412 = vector.broadcast %cst_104 : f32 to vector<8x32xf32>
    %413 = arith.addf %412, %411 : vector<8x32xf32>
    %414 = arith.divf %412, %413 : vector<8x32xf32>
    %415 = vector.extract_strided_slice %402 {offsets = [0, 64], sizes = [8, 32], strides = [1, 1]} : vector<8x128xf32> to vector<8x32xf32>
    %416 = math.tanh %415 : vector<8x32xf32>
    %417 = vector.extract_strided_slice %402 {offsets = [0, 96], sizes = [8, 32], strides = [1, 1]} : vector<8x128xf32> to vector<8x32xf32>
    %418 = arith.negf %417 : vector<8x32xf32>
    %419 = math.exp %418 : vector<8x32xf32>
    %cst_105 = arith.constant 1.000000e+00 : f32
    %420 = vector.broadcast %cst_105 : f32 to vector<8x32xf32>
    %421 = arith.addf %420, %419 : vector<8x32xf32>
    %422 = arith.divf %420, %421 : vector<8x32xf32>
    %423 = arith.mulf %414, %356 : vector<8x32xf32>
    %424 = arith.mulf %408, %416 : vector<8x32xf32>
    %425 = arith.addf %423, %424 : vector<8x32xf32>
    %426 = math.tanh %425 : vector<8x32xf32>
    %427 = arith.mulf %422, %426 : vector<8x32xf32>
    %428 = arith.index_cast %397 : i32 to index
    %c0_106 = arith.constant 0 : index
    %429 = vector.load %arg15[%428, %c0_106] : memref<64x32xf32, #tpu.memory_space<vmem>>, vector<8x32xf32>
    tpu.vector_store %arg15[%428, %c0_106], %427 {strides = array<i32>} : memref<64x32xf32, #tpu.memory_space<vmem>>, vector<8x32xf32>,
    %c6_i32 = arith.constant 6 : i32
    %c8_i32_107 = arith.constant 8 : i32
    %430 = arith.muli %c6_i32, %c8_i32_107 : i32
    %431 = tpu.assume_multiple %430, 8 : i32
    %432 = arith.index_cast %431 : i32 to index
    %c0_108 = arith.constant 0 : index
    %433 = vector.load %arg12[%432, %c0_108] : memref<64x128xf32, #tpu.memory_space<vmem>>, vector<8x128xf32>
    %434 = arith.truncf %392 : vector<8x32xf32> to vector<8x32xbf16>
    %cst_109 = arith.constant dense<0.000000e+00> : vector<8x128xf32>
    %435 = tpu.matmul %434, %13, %cst_109 {dimension_numbers = #tpu.dot_dimension_numbers<[1], [0], [0], [1], [0, 0, 1, 1], [], []>} : vector<8x32xbf16>, vector<32x128xbf16>, vector<8x128xf32> -> vector<8x128xf32>
    %436 = arith.addf %433, %435 : vector<8x128xf32>
    %437 = vector.extract_strided_slice %436 {offsets = [0, 0], sizes = [8, 32], strides = [1, 1]} : vector<8x128xf32> to vector<8x32xf32>
    %438 = arith.negf %437 : vector<8x32xf32>
    %439 = math.exp %438 : vector<8x32xf32>
    %cst_110 = arith.constant 1.000000e+00 : f32
    %440 = vector.broadcast %cst_110 : f32 to vector<8x32xf32>
    %441 = arith.addf %440, %439 : vector<8x32xf32>
    %442 = arith.divf %440, %441 : vector<8x32xf32>
    %443 = vector.extract_strided_slice %436 {offsets = [0, 32], sizes = [8, 32], strides = [1, 1]} : vector<8x128xf32> to vector<8x32xf32>
    %444 = arith.negf %443 : vector<8x32xf32>
    %445 = math.exp %444 : vector<8x32xf32>
    %cst_111 = arith.constant 1.000000e+00 : f32
    %446 = vector.broadcast %cst_111 : f32 to vector<8x32xf32>
    %447 = arith.addf %446, %445 : vector<8x32xf32>
    %448 = arith.divf %446, %447 : vector<8x32xf32>
    %449 = vector.extract_strided_slice %436 {offsets = [0, 64], sizes = [8, 32], strides = [1, 1]} : vector<8x128xf32> to vector<8x32xf32>
    %450 = math.tanh %449 : vector<8x32xf32>
    %451 = vector.extract_strided_slice %436 {offsets = [0, 96], sizes = [8, 32], strides = [1, 1]} : vector<8x128xf32> to vector<8x32xf32>
    %452 = arith.negf %451 : vector<8x32xf32>
    %453 = math.exp %452 : vector<8x32xf32>
    %cst_112 = arith.constant 1.000000e+00 : f32
    %454 = vector.broadcast %cst_112 : f32 to vector<8x32xf32>
    %455 = arith.addf %454, %453 : vector<8x32xf32>
    %456 = arith.divf %454, %455 : vector<8x32xf32>
    %457 = arith.mulf %448, %390 : vector<8x32xf32>
    %458 = arith.mulf %442, %450 : vector<8x32xf32>
    %459 = arith.addf %457, %458 : vector<8x32xf32>
    %460 = math.tanh %459 : vector<8x32xf32>
    %461 = arith.mulf %456, %460 : vector<8x32xf32>
    %462 = arith.index_cast %431 : i32 to index
    %c0_113 = arith.constant 0 : index
    %463 = vector.load %arg14[%462, %c0_113] : memref<64x32xf32, #tpu.memory_space<vmem>>, vector<8x32xf32>
    tpu.vector_store %arg14[%462, %c0_113], %461 {strides = array<i32>} : memref<64x32xf32, #tpu.memory_space<vmem>>, vector<8x32xf32>,
    %c7_i32_114 = arith.constant 7 : i32
    %464 = arith.subi %c7_i32_114, %c6_i32 : i32
    %c8_i32_115 = arith.constant 8 : i32
    %465 = arith.muli %464, %c8_i32_115 : i32
    %466 = tpu.assume_multiple %465, 8 : i32
    %467 = arith.index_cast %466 : i32 to index
    %c0_116 = arith.constant 0 : index
    %468 = vector.load %arg13[%467, %c0_116] : memref<64x128xf32, #tpu.memory_space<vmem>>, vector<8x128xf32>
    %469 = arith.truncf %427 : vector<8x32xf32> to vector<8x32xbf16>
    %cst_117 = arith.constant dense<0.000000e+00> : vector<8x128xf32>
    %470 = tpu.matmul %469, %14, %cst_117 {dimension_numbers = #tpu.dot_dimension_numbers<[1], [0], [0], [1], [0, 0, 1, 1], [], []>} : vector<8x32xbf16>, vector<32x128xbf16>, vector<8x128xf32> -> vector<8x128xf32>
    %471 = arith.addf %468, %470 : vector<8x128xf32>
    %472 = vector.extract_strided_slice %471 {offsets = [0, 0], sizes = [8, 32], strides = [1, 1]} : vector<8x128xf32> to vector<8x32xf32>
    %473 = arith.negf %472 : vector<8x32xf32>
    %474 = math.exp %473 : vector<8x32xf32>
    %cst_118 = arith.constant 1.000000e+00 : f32
    %475 = vector.broadcast %cst_118 : f32 to vector<8x32xf32>
    %476 = arith.addf %475, %474 : vector<8x32xf32>
    %477 = arith.divf %475, %476 : vector<8x32xf32>
    %478 = vector.extract_strided_slice %471 {offsets = [0, 32], sizes = [8, 32], strides = [1, 1]} : vector<8x128xf32> to vector<8x32xf32>
    %479 = arith.negf %478 : vector<8x32xf32>
    %480 = math.exp %479 : vector<8x32xf32>
    %cst_119 = arith.constant 1.000000e+00 : f32
    %481 = vector.broadcast %cst_119 : f32 to vector<8x32xf32>
    %482 = arith.addf %481, %480 : vector<8x32xf32>
    %483 = arith.divf %481, %482 : vector<8x32xf32>
    %484 = vector.extract_strided_slice %471 {offsets = [0, 64], sizes = [8, 32], strides = [1, 1]} : vector<8x128xf32> to vector<8x32xf32>
    %485 = math.tanh %484 : vector<8x32xf32>
    %486 = vector.extract_strided_slice %471 {offsets = [0, 96], sizes = [8, 32], strides = [1, 1]} : vector<8x128xf32> to vector<8x32xf32>
    %487 = arith.negf %486 : vector<8x32xf32>
    %488 = math.exp %487 : vector<8x32xf32>
    %cst_120 = arith.constant 1.000000e+00 : f32
    %489 = vector.broadcast %cst_120 : f32 to vector<8x32xf32>
    %490 = arith.addf %489, %488 : vector<8x32xf32>
    %491 = arith.divf %489, %490 : vector<8x32xf32>
    %492 = arith.mulf %483, %425 : vector<8x32xf32>
    %493 = arith.mulf %477, %485 : vector<8x32xf32>
    %494 = arith.addf %492, %493 : vector<8x32xf32>
    %495 = math.tanh %494 : vector<8x32xf32>
    %496 = arith.mulf %491, %495 : vector<8x32xf32>
    %497 = arith.index_cast %466 : i32 to index
    %c0_121 = arith.constant 0 : index
    %498 = vector.load %arg15[%497, %c0_121] : memref<64x32xf32, #tpu.memory_space<vmem>>, vector<8x32xf32>
    tpu.vector_store %arg15[%497, %c0_121], %496 {strides = array<i32>} : memref<64x32xf32, #tpu.memory_space<vmem>>, vector<8x32xf32>,
    %c7_i32_122 = arith.constant 7 : i32
    %c8_i32_123 = arith.constant 8 : i32
    %499 = arith.muli %c7_i32_122, %c8_i32_123 : i32
    %500 = tpu.assume_multiple %499, 8 : i32
    %501 = arith.index_cast %500 : i32 to index
    %c0_124 = arith.constant 0 : index
    %502 = vector.load %arg12[%501, %c0_124] : memref<64x128xf32, #tpu.memory_space<vmem>>, vector<8x128xf32>
    %503 = arith.truncf %461 : vector<8x32xf32> to vector<8x32xbf16>
    %cst_125 = arith.constant dense<0.000000e+00> : vector<8x128xf32>
    %504 = tpu.matmul %503, %13, %cst_125 {dimension_numbers = #tpu.dot_dimension_numbers<[1], [0], [0], [1], [0, 0, 1, 1], [], []>} : vector<8x32xbf16>, vector<32x128xbf16>, vector<8x128xf32> -> vector<8x128xf32>
    %505 = arith.addf %502, %504 : vector<8x128xf32>
    %506 = vector.extract_strided_slice %505 {offsets = [0, 0], sizes = [8, 32], strides = [1, 1]} : vector<8x128xf32> to vector<8x32xf32>
    %507 = arith.negf %506 : vector<8x32xf32>
    %508 = math.exp %507 : vector<8x32xf32>
    %cst_126 = arith.constant 1.000000e+00 : f32
    %509 = vector.broadcast %cst_126 : f32 to vector<8x32xf32>
    %510 = arith.addf %509, %508 : vector<8x32xf32>
    %511 = arith.divf %509, %510 : vector<8x32xf32>
    %512 = vector.extract_strided_slice %505 {offsets = [0, 32], sizes = [8, 32], strides = [1, 1]} : vector<8x128xf32> to vector<8x32xf32>
    %513 = arith.negf %512 : vector<8x32xf32>
    %514 = math.exp %513 : vector<8x32xf32>
    %cst_127 = arith.constant 1.000000e+00 : f32
    %515 = vector.broadcast %cst_127 : f32 to vector<8x32xf32>
    %516 = arith.addf %515, %514 : vector<8x32xf32>
    %517 = arith.divf %515, %516 : vector<8x32xf32>
    %518 = vector.extract_strided_slice %505 {offsets = [0, 64], sizes = [8, 32], strides = [1, 1]} : vector<8x128xf32> to vector<8x32xf32>
    %519 = math.tanh %518 : vector<8x32xf32>
    %520 = vector.extract_strided_slice %505 {offsets = [0, 96], sizes = [8, 32], strides = [1, 1]} : vector<8x128xf32> to vector<8x32xf32>
    %521 = arith.negf %520 : vector<8x32xf32>
    %522 = math.exp %521 : vector<8x32xf32>
    %cst_128 = arith.constant 1.000000e+00 : f32
    %523 = vector.broadcast %cst_128 : f32 to vector<8x32xf32>
    %524 = arith.addf %523, %522 : vector<8x32xf32>
    %525 = arith.divf %523, %524 : vector<8x32xf32>
    %526 = arith.mulf %517, %459 : vector<8x32xf32>
    %527 = arith.mulf %511, %519 : vector<8x32xf32>
    %528 = arith.addf %526, %527 : vector<8x32xf32>
    %529 = math.tanh %528 : vector<8x32xf32>
    %530 = arith.mulf %525, %529 : vector<8x32xf32>
    %531 = arith.index_cast %500 : i32 to index
    %c0_129 = arith.constant 0 : index
    %532 = vector.load %arg14[%531, %c0_129] : memref<64x32xf32, #tpu.memory_space<vmem>>, vector<8x32xf32>
    tpu.vector_store %arg14[%531, %c0_129], %530 {strides = array<i32>} : memref<64x32xf32, #tpu.memory_space<vmem>>, vector<8x32xf32>,
    %c7_i32_130 = arith.constant 7 : i32
    %533 = arith.subi %c7_i32_130, %c7_i32_122 : i32
    %c8_i32_131 = arith.constant 8 : i32
    %534 = arith.muli %533, %c8_i32_131 : i32
    %535 = tpu.assume_multiple %534, 8 : i32
    %536 = arith.index_cast %535 : i32 to index
    %c0_132 = arith.constant 0 : index
    %537 = vector.load %arg13[%536, %c0_132] : memref<64x128xf32, #tpu.memory_space<vmem>>, vector<8x128xf32>
    %538 = arith.truncf %496 : vector<8x32xf32> to vector<8x32xbf16>
    %cst_133 = arith.constant dense<0.000000e+00> : vector<8x128xf32>
    %539 = tpu.matmul %538, %14, %cst_133 {dimension_numbers = #tpu.dot_dimension_numbers<[1], [0], [0], [1], [0, 0, 1, 1], [], []>} : vector<8x32xbf16>, vector<32x128xbf16>, vector<8x128xf32> -> vector<8x128xf32>
    %540 = arith.addf %537, %539 : vector<8x128xf32>
    %541 = vector.extract_strided_slice %540 {offsets = [0, 0], sizes = [8, 32], strides = [1, 1]} : vector<8x128xf32> to vector<8x32xf32>
    %542 = arith.negf %541 : vector<8x32xf32>
    %543 = math.exp %542 : vector<8x32xf32>
    %cst_134 = arith.constant 1.000000e+00 : f32
    %544 = vector.broadcast %cst_134 : f32 to vector<8x32xf32>
    %545 = arith.addf %544, %543 : vector<8x32xf32>
    %546 = arith.divf %544, %545 : vector<8x32xf32>
    %547 = vector.extract_strided_slice %540 {offsets = [0, 32], sizes = [8, 32], strides = [1, 1]} : vector<8x128xf32> to vector<8x32xf32>
    %548 = arith.negf %547 : vector<8x32xf32>
    %549 = math.exp %548 : vector<8x32xf32>
    %cst_135 = arith.constant 1.000000e+00 : f32
    %550 = vector.broadcast %cst_135 : f32 to vector<8x32xf32>
    %551 = arith.addf %550, %549 : vector<8x32xf32>
    %552 = arith.divf %550, %551 : vector<8x32xf32>
    %553 = vector.extract_strided_slice %540 {offsets = [0, 64], sizes = [8, 32], strides = [1, 1]} : vector<8x128xf32> to vector<8x32xf32>
    %554 = math.tanh %553 : vector<8x32xf32>
    %555 = vector.extract_strided_slice %540 {offsets = [0, 96], sizes = [8, 32], strides = [1, 1]} : vector<8x128xf32> to vector<8x32xf32>
    %556 = arith.negf %555 : vector<8x32xf32>
    %557 = math.exp %556 : vector<8x32xf32>
    %cst_136 = arith.constant 1.000000e+00 : f32
    %558 = vector.broadcast %cst_136 : f32 to vector<8x32xf32>
    %559 = arith.addf %558, %557 : vector<8x32xf32>
    %560 = arith.divf %558, %559 : vector<8x32xf32>
    %561 = arith.mulf %552, %494 : vector<8x32xf32>
    %562 = arith.mulf %546, %554 : vector<8x32xf32>
    %563 = arith.addf %561, %562 : vector<8x32xf32>
    %564 = math.tanh %563 : vector<8x32xf32>
    %565 = arith.mulf %560, %564 : vector<8x32xf32>
    %566 = arith.index_cast %535 : i32 to index
    %c0_137 = arith.constant 0 : index
    %567 = vector.load %arg15[%566, %c0_137] : memref<64x32xf32, #tpu.memory_space<vmem>>, vector<8x32xf32>
    tpu.vector_store %arg15[%566, %c0_137], %565 {strides = array<i32>} : memref<64x32xf32, #tpu.memory_space<vmem>>, vector<8x32xf32>,
    %c8_i32_138 = arith.constant 8 : i32
    %c0_139 = arith.constant 0 : index
    %c0_140 = arith.constant 0 : index
    %568 = vector.load %arg14[%c0_139, %c0_140] : memref<64x32xf32, #tpu.memory_space<vmem>>, vector<64x32xf32>
    %569 = arith.truncf %568 : vector<64x32xf32> to vector<64x32xbf16>
    %c0_141 = arith.constant 0 : index
    %c0_142 = arith.constant 0 : index
    %570 = vector.load %arg8[%c0_141, %c0_142] : memref<32x128xbf16, #tpu.memory_space<vmem>>, vector<32x128xbf16>
    %cst_143 = arith.constant dense<0.000000e+00> : vector<64x128xf32>
    %571 = tpu.matmul %569, %570, %cst_143 {dimension_numbers = #tpu.dot_dimension_numbers<[1], [0], [0], [1], [0, 0, 1, 1], [], []>} : vector<64x32xbf16>, vector<32x128xbf16>, vector<64x128xf32> -> vector<64x128xf32>
    %c0_144 = arith.constant 0 : index
    %c0_145 = arith.constant 0 : index
    %572 = vector.load %arg15[%c0_144, %c0_145] : memref<64x32xf32, #tpu.memory_space<vmem>>, vector<64x32xf32>
    %573 = arith.truncf %572 : vector<64x32xf32> to vector<64x32xbf16>
    %c0_146 = arith.constant 0 : index
    %c0_147 = arith.constant 0 : index
    %574 = vector.load %arg9[%c0_146, %c0_147] : memref<32x128xbf16, #tpu.memory_space<vmem>>, vector<32x128xbf16>
    %cst_148 = arith.constant dense<0.000000e+00> : vector<64x128xf32>
    %575 = tpu.matmul %573, %574, %cst_148 {dimension_numbers = #tpu.dot_dimension_numbers<[1], [0], [0], [1], [0, 0, 1, 1], [], []>} : vector<64x32xbf16>, vector<32x128xbf16>, vector<64x128xf32> -> vector<64x128xf32>
    %576 = arith.addf %571, %575 : vector<64x128xf32>
    %c0_149 = arith.constant 0 : index
    %c0_150 = arith.constant 0 : index
    %577 = vector.load %arg10[%c0_149, %c0_150] : memref<1x128xf32, #tpu.memory_space<vmem>>, vector<1x128xf32>
    %578 = vector.broadcast %577 : vector<1x128xf32> to vector<64x128xf32>
    %579 = arith.addf %576, %578 : vector<64x128xf32>
    %cst_151 = arith.constant dense<0xFF800000> : vector<64xf32>
    %580 = vector.multi_reduction <maximumf>, %579, %cst_151 [1] : vector<64x128xf32> to vector<64xf32>
    %581 = vector.shape_cast %580 : vector<64xf32> to vector<64x1xf32>
    %582 = vector.broadcast %581 : vector<64x1xf32> to vector<64x128xf32>
    %583 = arith.subf %579, %582 : vector<64x128xf32>
    %584 = math.exp %583 : vector<64x128xf32>
    %cst_152 = arith.constant dense<0.000000e+00> : vector<64xf32>
    %585 = vector.multi_reduction <add>, %584, %cst_152 [1] : vector<64x128xf32> to vector<64xf32>
    %586 = vector.shape_cast %585 : vector<64xf32> to vector<64x1xf32>
    %587 = math.log %586 : vector<64x1xf32>
    %588 = vector.broadcast %587 : vector<64x1xf32> to vector<64x128xf32>
    %589 = arith.subf %583, %588 : vector<64x128xf32>
    %c0_153 = arith.constant 0 : index
    %c0_154 = arith.constant 0 : index
    %590 = vector.load %arg11[%c0_153, %c0_154] : memref<64x128xf32, #tpu.memory_space<vmem>>, vector<64x128xf32>
    tpu.vector_store %arg11[%c0_153, %c0_154], %589 {strides = array<i32>} : memref<64x128xf32, #tpu.memory_space<vmem>>, vector<64x128xf32>,
    return
  }
  func.func @transform_0(%arg0: i32) -> (i32, i32) {
    %c0_i32 = arith.constant 0 : i32
    %c0_i32_0 = arith.constant 0 : i32
    %c0_i32_1 = arith.constant 0 : i32
    return %c0_i32, %c0_i32_0 : i32, i32
  }
  func.func @transform_1(%arg0: i32) -> (i32, i32) {
    %c0_i32 = arith.constant 0 : i32
    %c0_i32_0 = arith.constant 0 : i32
    %c0_i32_1 = arith.constant 0 : i32
    return %c0_i32, %c0_i32_0 : i32, i32
  }
  func.func @transform_2(%arg0: i32) -> (i32, i32) {
    %c0_i32 = arith.constant 0 : i32
    %c0_i32_0 = arith.constant 0 : i32
    %c0_i32_1 = arith.constant 0 : i32
    return %c0_i32, %c0_i32_0 : i32, i32
  }
  func.func @transform_3(%arg0: i32) -> (i32, i32) {
    %c0_i32 = arith.constant 0 : i32
    %c0_i32_0 = arith.constant 0 : i32
    %c0_i32_1 = arith.constant 0 : i32
    return %c0_i32, %c0_i32_0 : i32, i32
  }
  func.func @transform_4(%arg0: i32) -> (i32, i32) {
    %c0_i32 = arith.constant 0 : i32
    %c0_i32_0 = arith.constant 0 : i32
    %c0_i32_1 = arith.constant 0 : i32
    return %c0_i32, %c0_i32_0 : i32, i32
  }
  func.func @transform_5(%arg0: i32) -> (i32, i32) {
    %c0_i32 = arith.constant 0 : i32
    %c0_i32_0 = arith.constant 0 : i32
    %c0_i32_1 = arith.constant 0 : i32
    return %c0_i32, %c0_i32_0 : i32, i32
  }
  func.func @transform_6(%arg0: i32) -> (i32, i32) {
    %c0_i32 = arith.constant 0 : i32
    %c0_i32_0 = arith.constant 0 : i32
    %c0_i32_1 = arith.constant 0 : i32
    return %c0_i32, %c0_i32_0 : i32, i32
  }
  func.func @transform_7(%arg0: i32) -> (i32, i32) {
    %c0_i32 = arith.constant 0 : i32
    %c0_i32_0 = arith.constant 0 : i32
    %c0_i32_1 = arith.constant 0 : i32
    return %c0_i32, %c0_i32_0 : i32, i32
  }
  func.func @transform_8(%arg0: i32) -> (i32, i32) {
    %c0_i32 = arith.constant 0 : i32
    %c0_i32_0 = arith.constant 0 : i32
    %c0_i32_1 = arith.constant 0 : i32
    return %c0_i32, %c0_i32_0 : i32, i32
  }
  func.func @transform_9(%arg0: i32) -> (i32, i32) {
    %c0_i32 = arith.constant 0 : i32
    %c0_i32_0 = arith.constant 0 : i32
    %c0_i32_1 = arith.constant 0 : i32
    return %c0_i32, %c0_i32_0 : i32, i32
  }
  func.func @transform_10(%arg0: i32) -> (i32, i32) {
    %c0_i32 = arith.constant 0 : i32
    %c0_i32_0 = arith.constant 0 : i32
    %c0_i32_1 = arith.constant 0 : i32
    return %c0_i32, %c0_i32_0 : i32, i32
  }
}

</mosaic_0001>

<bundles_post_ra>
// kernel: bilstm_tagger_forward.1
= control target key start
LH: loop header
LB: loop body
LE: loop exit
PB: predicated region body
PF: predicated region fallthrough
CT: control target
= control target key end

     0   :  { %v2385_v1 = vmov 0.0   ;;  %vm2386_vm0 = vmmov 0   ;;  %vm87_vm1 = vcmask 261120   ;;  %v2387_v10 = vmov 0   ;;  %s2389_s15 = smov 32   ;;  %s2936_s1 = inlined_call_operand.vmem [shape: bf16[32,128], index: 1, kind: input, shape index: {}]   ;;  %s2937_s5 = inlined_call_operand.vmem [shape: bf16[32,128], index: 5, kind: input, shape index: {}]   ;;  %s2938_s0 = inlined_call_operand.vmem [shape: bf16[64,32], index: 0, kind: input, shape index: {}]   ;;  %s2939_s2 = inlined_call_operand.vmem [shape: bf16[32,128], index: 2, kind: input, shape index: {}]   ;;  %s2940_s6 = inlined_call_operand.vmem [shape: bf16[32,128], index: 6, kind: input, shape index: {}]   ;;  %s2941_s3 = inlined_call_operand.vmem [shape: f32[1,128], index: 3, kind: input, shape index: {}]   ;;  %s2942_s4 = inlined_call_operand.vmem [shape: f32[1,128], index: 4, kind: input, shape index: {}]   ;;  %s2943_s8 = inlined_call_operand.vmem [shape: bf16[32,128], index: 8, kind: input, shape index: {}]   ;;  %s2944_s7 = inlined_call_operand.vmem [shape: bf16[32,128], index: 7, kind: input, shape index: {}]   ;;  %s2945_s9 = inlined_call_operand.vmem [shape: f32[1,128], index: 9, kind: input, shape index: {}]   ;;  %s2946_s10 = inlined_call_operand.vmem [shape: f32[64,128], index: 10, kind: output, shape index: {}]  }
   0x1   :  { %v2209_v0 = vld [vmem:[%s2936_s1] sm:$0xff]   ;;  %2044 = vmatprep.subr.bf16.mxu0 %v2385_v1  ;;  %2048 = vmatprep.mubr.msk.bf16.mxu0 %vm2386_vm0, %v2385_v1  ;;  %v2210_v2 = vld [vmem:[%s2936_s1 + $0x8] sm:$0xff]   ;;  %v2216_v8 = vld [vmem:[%s2938_s0 + $0x10] sm:$0xff]  }
   0x2   :  { %2020 = vmatprep.subr.bf16.mxu1 %v2209_v0  ;;  %v2457_v3 = vld [vmem:[%s2937_s5] sm:$0xff]   ;;  %v2213_v5 = vld [vmem:[%s2938_s0 + $0x8] sm:$0xff]   ;;  %v2217_v11 = vld [vmem:[%s2938_s0 + $0x18] sm:$0xff]  }
   0x3   :  { %2021 = vmatpush3.bf16.msra.mxu1 %v2209_v0  ;;  %v2212_v4 = vld [vmem:[%s2938_s0] sm:$0xff]   ;;  %2045 = vmatpush3.bf16.msra.mxu0 %v2457_v3  ;;  %v2474_v7 = vld [vmem:[%s2937_s5 + $0x8] sm:$0xff]  }
   0x4   :  { %2022 = vmatprep.subr.bf16.mxu1 %v2210_v2  ;;  %2024 = vmatprep.mubr.msk.bf16.mxu1 %vm87_vm1, %v2212_v4  ;;  %v2214_v6 = vld [vmem:[%s2939_s2] sm:$0xff]   ;;  %v2218_v9 = vld [vmem:[%s2939_s2 + $0x8] sm:$0xff]  }
   0x5   :  { %2046 = vmatprep.subr.bf16.mxu0 %v2385_v1  ;;  %v2501_v12 = vld [vmem:[%s2940_s6] sm:$0xff]   ;;  %v2509_v13 = vld [vmem:[%s2940_s6 + $0x8] sm:$0xff]  }
   0x6   :  { %v1883_v14 = vld [vmem:[%s2941_s3] ss:$0 sm:$0xff] }
   0x7   :  { %2023 = vmatpush3.bf16.msra.mxu1 %v2210_v2  ;;  %2047 = vmatpush3.bf16.msra.mxu0 %v2474_v7  ;;  %v1894_v36 = vld [vmem:[%s2942_s4] ss:$0 sm:$0xff]  ;;  %s2388_s4 = smov 64  }
   0x8   :  { %2032 = vmatprep.subr.bf16.mxu1 %v2214_v6  ;;  %2060 = vmatprep.subr.bf16.mxu0 %v2385_v1 }
   0xa   :  { %2025 = vmatmul.mubr.msk.bf16.vlgmr.msra.gmra.mrb[0].mxu1 %vm87_vm1, %v2213_v5  ;;  %2049 = vmatmul.mubr.bf16.vlgmr.msra.gmra.mrb[0].mxu0 %v2387_v10 }
   0xb   :  { %2033 = vmatpush3.bf16.msra.mxu1 %v2214_v6  ;;  %2028 = vmatprep.mubr.msk.bf16.mxu1 %vm87_vm1, %v2216_v8 }
   0xc   :  { %2034 = vmatprep.subr.bf16.mxu1 %v2218_v9  ;;  %2061 = vmatpush3.bf16.msra.mxu0 %v2457_v3 }
   0xd   :  { %2064 = vmatprep.mubr.msk.bf16.mxu0 %vm2386_vm0, %v2385_v1  ;;  %2062 = vmatprep.subr.bf16.mxu0 %v2385_v1 }
   0xf   :  { %2035 = vmatpush3.bf16.msra.mxu1 %v2218_v9 }
  0x10   :  { %2052 = vmatprep.subr.bf16.mxu1 %v2385_v1  ;;  %2063 = vmatpush3.bf16.msra.mxu0 %v2474_v7 }
  0x11   :  { %2076 = vmatprep.subr.bf16.mxu0 %v2385_v1 }
  0x12   :  { %2029 = vmatmul.mubr.msk.bf16.gmra.mrb[4].mxu1 %vm87_vm1, %v2217_v11 }
  0x13   :  { %2036 = vmatprep.mubr.msk.bf16.mxu1 %vm87_vm1, %v2212_v4 }
  0x1a   :  { %2037 = vmatmul.mubr.msk.bf16.vlgmr.msra.gmra.mrb[8].mxu1 %vm87_vm1, %v2213_v5 }
  0x1b   :  { %2053 = vmatpush3.bf16.msra.mxu1 %v2501_v12  ;;  %2040 = vmatprep.mubr.msk.bf16.mxu1 %vm87_vm1, %v2216_v8 }
  0x1c   :  { %2054 = vmatprep.subr.bf16.mxu1 %v2385_v1 }
  0x1f   :  { %2055 = vmatpush3.bf16.msra.mxu1 %v2509_v13 }
  0x20   :  { %2068 = vmatprep.subr.bf16.mxu1 %v2385_v1 }
  0x22   :  { %2041 = vmatmul.mubr.msk.bf16.gmra.mrb[12].mxu1 %vm87_vm1, %v2217_v11 }
  0x23   :  { %2056 = vmatprep.mubr.msk.bf16.mxu1 %vm2386_vm0, %v2385_v1 }
  0x2a   :  { %2057 = vmatmul.mubr.bf16.vlgmr.msra.gmra.mrb[16].mxu1 %v2387_v10 }
  0x2b   :  { %2069 = vmatpush3.bf16.msra.mxu1 %v2501_v12  ;;  %2072 = vmatprep.mubr.msk.bf16.mxu1 %vm2386_vm0, %v2385_v1 }
  0x2c   :  { %2070 = vmatprep.subr.bf16.mxu1 %v2385_v1 }
  0x2f   :  { %2071 = vmatpush3.bf16.msra.mxu1 %v2509_v13 }
  0x30   :  { %2084 = vmatprep.subr.bf16.mxu1 %v2385_v1 }
  0xdd   :  { %v2026_v15 = vpop.f32.mrb[0].mxu1  ;;  %v327_v18 = vpop.f32.mrb[0].mxu0 }
  0xde   :  { %v2526_v16 = vadd.f32 %v2026_v15, %v1883_v14  ;;  %v134_v17 = vpop.f32.mrb[1].mxu1  ;;  %v2050_v21 = vpop.f32.mrb[1].mxu0 }
  0xdf   :  { %v135_v19 = vadd.f32 %v1883_v14, %v134_v17  ;;  %v2027_v20 = vpop.f32.mrb[2].mxu1  ;;  %v330_v24 = vpop.f32.mrb[2].mxu0 }
  0xe0   :  { %v2528_v22 = vadd.f32 %v2027_v20, %v1883_v14  ;;  %v137_v23 = vpop.f32.mrb[3].mxu1  ;;  %v2051_v27 = vpop.f32.mrb[3].mxu0 }
  0xe1   :  { %v2530_v25 = vadd.f32 %v1883_v14, %v137_v23  ;;  %v333_v26 = vadd.f32 %v327_v18, %v135_v19 }
  0xe3   :  { %v1903_v61 = vmul.f32 -1.442695, %v333_v26 }
  0xe5   :  { %v2030_v28 = vpop.f32.mrb[4].mxu1 }
  0xe6   :  { %v2532_v29 = vadd.f32 %v2030_v28, %v1883_v14  ;;  %v150_v30 = vpop.f32.mrb[5].mxu1 }
  0xe7   :  { %v2534_v31 = vadd.f32 %v1883_v14, %v150_v30  ;;  %v2031_v32 = vpop.f32.mrb[6].mxu1 }
  0xe8   :  { %v2536_v33 = vadd.f32 %v2031_v32, %v1883_v14  ;;  %v153_v34 = vpop.f32.mrb[7].mxu1 }
  0xe9   :  { %v2538_v35 = vadd.f32 %v1883_v14, %v153_v34 }
  0xed   :  { %v2038_v37 = vpop.f32.mrb[8].mxu1 }
  0xee   :  { %v2543_v38 = vadd.f32 %v2038_v37, %v1894_v36  ;;  %v230_v39 = vpop.f32.mrb[9].mxu1 }
  0xef   :  { %v2545_v40 = vadd.f32 %v1894_v36, %v230_v39  ;;  %v2039_v41 = vpop.f32.mrb[10].mxu1 }
  0xf0   :  { %v2547_v42 = vadd.f32 %v2039_v41, %v1894_v36  ;;  %v233_v43 = vpop.f32.mrb[11].mxu1 }
  0xf1   :  { %v2549_v44 = vadd.f32 %v1894_v36, %v233_v43 }
  0xf5   :  { %v2042_v45 = vpop.f32.mrb[12].mxu1 }
  0xf6   :  { %v2551_v46 = vadd.f32 %v2042_v45, %v1894_v36  ;;  %v246_v47 = vpop.f32.mrb[13].mxu1 }
  0xf7   :  { %v2553_v48 = vadd.f32 %v1894_v36, %v246_v47  ;;  %v2043_v49 = vpop.f32.mrb[14].mxu1 }
  0xf8   :  { %v249_v50 = vpop.f32.mrb[15].mxu1  ;;  %v258_v52 = vadd.f32 %v2043_v49, %v1894_v36 }
  0xf9   :  { %v2555_v51 = vadd.f32 %v1894_v36, %v249_v50 }
  0xfd   :  { %v411_v53 = vpop.f32.mrb[16].mxu1 }
  0xfe   :  { %v417_v54 = vadd.f32 %v411_v53, %v258_v52  ;;  %v2058_v55 = vpop.f32.mrb[17].mxu1 }
  0xff   :  { %v414_v56 = vpop.f32.mrb[18].mxu1 }
 0x100   :  { %2225 = vtanh.f32 %v417_v54  ;;  %v2059_v57 = vpop.f32.mrb[19].mxu1  ;;  %v1906_v60 = vmul.f32 -1.442695, %v417_v54 }
 0x101   :  { %2227 = vtanh.f32 %v333_v26 }
 0x102   :  { %2229 = vpow2.f32 %v1906_v60 }
 0x103   :  { %2231 = vpow2.f32 %v1903_v61 }
 0x10a   :  { %v2226_v58 = vpop.eup %2225 }
 0x10b   :  { %427 = vrot.lane.b32.xlu0 %v2226_v58, %s2388_s4  ;;  %v2228_v59 = vpop.eup %2227 }
 0x10c   :  { %v2230_v62 = vpop.eup %2229 }
 0x10d   :  { %v421_v63 = vadd.f32 1.0, %v2230_v62  ;;  %v2232_v0 = vpop.eup %2231 }
 0x10e   :  { %v337_v2 = vadd.f32 1.0, %v2232_v0 }
 0x10f   :  { %343 = vrot.lane.b32.xlu0 %v2228_v59, %s2388_s4  ;;  %2233 = vrcp.f32 %v421_v63 }
 0x110   :  { %2235 = vrcp.f32 %v337_v2 }
 0x119   :  { %v2234_v4 = vpop.eup %2233 }
 0x11a   :  { %v2236_v8 = vpop.eup %2235  ;;  %v425_v11 = vmul.f32 0.0, %v2234_v4 }
 0x11b   :  { %v341_v17 = vmul.f32 0.0, %v2236_v8 }
 0x17d   :  { %v428_v5 = vpop.permute.xlu0 %427 }
 0x17e   :  { %v430_v6 = vmul.f32 %v2234_v4, %v428_v5 }
 0x180   :  { %432 = vrot.lane.b32.xlu1 %v430_v6, %s2389_s15 }
 0x181   :  { %v344_v9 = vpop.permute.xlu0 %343 }
 0x182   :  { %v346_v10 = vmul.f32 %v2236_v8, %v344_v9 }
 0x184   :  { %348 = vrot.lane.b32.xlu1 %v346_v10, %s2389_s15 }
 0x1f2   :  { %v433_v14 = vpop.permute.xlu1 %432 }
 0x1f3   :  { %v2561_v15 = vadd.f32 %v433_v14, %v425_v11 }
 0x1f5   :  { %2237 = vtanh.f32 %v2561_v15 }
 0x1f6   :  { %v349_v18 = vpop.permute.xlu1 %348 }
 0x1f7   :  { %v2564_v19 = vadd.f32 %v349_v18, %v341_v17 }
 0x1f9   :  { %2239 = vtanh.f32 %v2564_v19 }
 0x1ff   :  { %v2238_v20 = vpop.eup %2237 }
 0x200   :  { %438 = vrot.lane.b32.xlu0 %v2238_v20, %s2388_s4 }
 0x203   :  { %v2240_v21 = vpop.eup %2239 }
 0x204   :  { %354 = vrot.lane.b32.xlu1 %v2240_v21, %s2388_s4 }
 0x272   :  { %v439_v23 = vpop.permute.xlu0 %438 }
 0x273   :  { %v2569_v24 = vmul.f32 %v2234_v4, %v439_v23 }
 0x275   :  { %v530_v26 = vpack.c.bf16 %v2569_v24, %v2569_v24 }
 0x276   :  { %v355_v27 = vpop.permute.xlu1 %354 }
 0x277   :  { %v2573_v28 = vmul.f32 %v2236_v8, %v355_v27  ;;  %532 = vrot.lane.b32.xlu0 %v530_v26, %s2389_s15 }
 0x279   :  { %v450_v30 = vpack.c.bf16 %v2573_v28, %v2573_v28 }
 0x27b   :  { %452 = vrot.lane.b32.xlu1 %v450_v30, %s2389_s15 }
 0x2e9   :  { %v533_v32 = vpop.permute.xlu0 %532 }
 0x2ea   :  { %2073 = vmatmul.mubr.msk.bf16.vlgmr.msra.gmra.mrb[20].mxu1 %vm87_vm1, %v533_v32 }
 0x2eb   :  { %2085 = vmatpush3.bf16.msra.mxu1 %v2501_v12  ;;  %2088 = vmatprep.mubr.msk.bf16.mxu1 %vm2386_vm0, %v2385_v1 }
 0x2ec   :  { %2086 = vmatprep.subr.bf16.mxu1 %v2385_v1 }
 0x2ed   :  { %v453_v34 = vpop.permute.xlu1 %452 }
 0x2ee   :  { %2065 = vmatmul.mubr.msk.bf16.vlgmr.msra.gmra.mrb[4].mxu0 %vm87_vm1, %v453_v34 }
 0x2ef   :  { %2077 = vmatpush3.bf16.msra.mxu0 %v2457_v3  ;;  %2087 = vmatpush3.bf16.msra.mxu1 %v2509_v13 }
 0x2f0   :  { %2078 = vmatprep.subr.bf16.mxu0 %v2385_v1  ;;  %2080 = vmatprep.mubr.msk.bf16.mxu0 %vm2386_vm0, %v2385_v1 }
 0x2f1   :  { %2100 = vmatprep.subr.bf16.mxu1 %v2385_v1 }
 0x2f3   :  { %2079 = vmatpush3.bf16.msra.mxu0 %v2474_v7 }
 0x2f4   :  { %2092 = vmatprep.subr.bf16.mxu0 %v2385_v1 }
 0x3bd   :  { %v571_v36 = vpop.f32.mrb[20].mxu1 }
 0x3be   :  { %v577_v37 = vadd.f32 %v571_v36, %v2551_v46  ;;  %v2074_v39 = vpop.f32.mrb[21].mxu1 }
 0x3bf   :  { %v574_v41 = vpop.f32.mrb[22].mxu1 }
 0x3c0   :  { %2241 = vtanh.f32 %v577_v37  ;;  %v2075_v43 = vpop.f32.mrb[23].mxu1  ;;  %v1910_v55 = vmul.f32 -1.442695, %v577_v37 }
 0x3c1   :  { %v491_v45 = vpop.f32.mrb[4].mxu0 }
 0x3c2   :  { %v497_v47 = vadd.f32 %v491_v45, %v2530_v25  ;;  %v2066_v49 = vpop.f32.mrb[5].mxu0 }
 0x3c3   :  { %v494_v50 = vpop.f32.mrb[6].mxu0 }
 0x3c4   :  { %2243 = vtanh.f32 %v497_v47  ;;  %v2067_v52 = vpop.f32.mrb[7].mxu0  ;;  %v1908_v46 = vmul.f32 -1.442695, %v497_v47 }
 0x3c5   :  { %2245 = vpow2.f32 %v1910_v55 }
 0x3c6   :  { %2247 = vpow2.f32 %v1908_v46 }
 0x3ca   :  { %v2242_v53 = vpop.eup %2241 }
 0x3cb   :  { %587 = vrot.lane.b32.xlu0 %v2242_v53, %s2388_s4 }
 0x3ce   :  { %v2244_v54 = vpop.eup %2243 }
 0x3cf   :  { %507 = vrot.lane.b32.xlu1 %v2244_v54, %s2388_s4  ;;  %v2246_v56 = vpop.eup %2245 }
 0x3d0   :  { %v581_v57 = vadd.f32 1.0, %v2246_v56  ;;  %v2248_v58 = vpop.eup %2247 }
 0x3d1   :  { %v501_v59 = vadd.f32 1.0, %v2248_v58 }
 0x3d2   :  { %2249 = vrcp.f32 %v581_v57 }
 0x3d3   :  { %2251 = vrcp.f32 %v501_v59 }
 0x3dc   :  { %v2250_v25 = vpop.eup %2249 }
 0x3dd   :  { %v2252_v62 = vpop.eup %2251  ;;  %v585_v2 = vmul.f32 %v2250_v25, %v2561_v15 }
 0x3de   :  { %v505_v6 = vmul.f32 %v2252_v62, %v2564_v19 }
 0x43d   :  { %v588_v60 = vpop.permute.xlu0 %587 }
 0x43e   :  { %v590_v61 = vmul.f32 %v2250_v25, %v588_v60 }
 0x440   :  { %592 = vrot.lane.b32.xlu0 %v590_v61, %s2389_s15 }
 0x441   :  { %v508_v63 = vpop.permute.xlu1 %507 }
 0x442   :  { %v510_v0 = vmul.f32 %v2252_v62, %v508_v63 }
 0x444   :  { %512 = vrot.lane.b32.xlu1 %v510_v0, %s2389_s15 }
 0x4b2   :  { %v593_v4 = vpop.permute.xlu0 %592 }
 0x4b3   :  { %v2600_v5 = vadd.f32 %v593_v4, %v585_v2 }
 0x4b5   :  { %2253 = vtanh.f32 %v2600_v5 }
 0x4b6   :  { %v513_v8 = vpop.permute.xlu1 %512 }
 0x4b7   :  { %v2604_v9 = vadd.f32 %v513_v8, %v505_v6 }
 0x4b9   :  { %2255 = vtanh.f32 %v2604_v9 }
 0x4bf   :  { %v2254_v10 = vpop.eup %2253 }
 0x4c0   :  { %598 = vrot.lane.b32.xlu0 %v2254_v10, %s2388_s4 }
 0x4c3   :  { %v2256_v11 = vpop.eup %2255 }
 0x4c4   :  { %518 = vrot.lane.b32.xlu1 %v2256_v11, %s2388_s4 }
 0x532   :  { %v599_v14 = vpop.permute.xlu0 %598 }
 0x533   :  { %v2609_v15 = vmul.f32 %v2250_v25, %v599_v14 }
 0x535   :  { %v690_v17 = vpack.c.bf16 %v2609_v15, %v2609_v15 }
 0x536   :  { %v519_v18 = vpop.permute.xlu1 %518 }
 0x537   :  { %v2613_v20 = vmul.f32 %v2252_v62, %v519_v18  ;;  %692 = vrot.lane.b32.xlu0 %v690_v17, %s2389_s15 }
 0x539   :  { %v610_v19 = vpack.c.bf16 %v2613_v20, %v2613_v20 }
 0x53b   :  { %612 = vrot.lane.b32.xlu1 %v610_v19, %s2389_s15 }
 0x5a9   :  { %v693_v21 = vpop.permute.xlu0 %692 }
 0x5aa   :  { %2089 = vmatmul.mubr.msk.bf16.vlgmr.msra.gmra.mrb[24].mxu1 %vm87_vm1, %v693_v21 }
 0x5ab   :  { %2101 = vmatpush3.bf16.msra.mxu1 %v2501_v12  ;;  %2104 = vmatprep.mubr.msk.bf16.mxu1 %vm2386_vm0, %v2385_v1 }
 0x5ac   :  { %2102 = vmatprep.subr.bf16.mxu1 %v2385_v1 }
 0x5ad   :  { %v613_v23 = vpop.permute.xlu1 %612 }
 0x5ae   :  { %2081 = vmatmul.mubr.msk.bf16.vlgmr.msra.gmra.mrb[8].mxu0 %vm87_vm1, %v613_v23 }
 0x5af   :  { %2093 = vmatpush3.bf16.msra.mxu0 %v2457_v3  ;;  %2103 = vmatpush3.bf16.msra.mxu1 %v2509_v13 }
 0x5b0   :  { %2094 = vmatprep.subr.bf16.mxu0 %v2385_v1  ;;  %2096 = vmatprep.mubr.msk.bf16.mxu0 %vm2386_vm0, %v2385_v1 }
 0x5b1   :  { %2116 = vmatprep.subr.bf16.mxu1 %v2385_v1 }
 0x5b3   :  { %2095 = vmatpush3.bf16.msra.mxu0 %v2474_v7 }
 0x5b4   :  { %2108 = vmatprep.subr.bf16.mxu0 %v2385_v1 }
 0x67d   :  { %v731_v26 = vpop.f32.mrb[24].mxu1 }
 0x67e   :  { %v737_v27 = vadd.f32 %v731_v26, %v2555_v51  ;;  %v2090_v30 = vpop.f32.mrb[25].mxu1 }
 0x67f   :  { %v734_v32 = vpop.f32.mrb[26].mxu1 }
 0x680   :  { %2257 = vtanh.f32 %v737_v27  ;;  %v2091_v34 = vpop.f32.mrb[27].mxu1  ;;  %v1914_v49 = vmul.f32 -1.442695, %v737_v27 }
 0x681   :  { %v651_v36 = vpop.f32.mrb[8].mxu0 }
 0x682   :  { %v657_v37 = vadd.f32 %v651_v36, %v2526_v16  ;;  %v2082_v39 = vpop.f32.mrb[9].mxu0 }
 0x683   :  { %v654_v41 = vpop.f32.mrb[10].mxu0 }
 0x684   :  { %2259 = vtanh.f32 %v657_v37  ;;  %v2083_v43 = vpop.f32.mrb[11].mxu0  ;;  %v1912_v51 = vmul.f32 -1.442695, %v657_v37 }
 0x685   :  { %2261 = vpow2.f32 %v1914_v49 }
 0x686   :  { %2263 = vpow2.f32 %v1912_v51 }
 0x68a   :  { %v2258_v45 = vpop.eup %2257 }
 0x68b   :  { %747 = vrot.lane.b32.xlu0 %v2258_v45, %s2388_s4 }
 0x68e   :  { %v2260_v47 = vpop.eup %2259 }
 0x68f   :  { %667 = vrot.lane.b32.xlu1 %v2260_v47, %s2388_s4  ;;  %v2262_v50 = vpop.eup %2261 }
 0x690   :  { %v741_v52 = vadd.f32 1.0, %v2262_v50  ;;  %v2264_v53 = vpop.eup %2263 }
 0x691   :  { %v661_v54 = vadd.f32 1.0, %v2264_v53 }
 0x692   :  { %2265 = vrcp.f32 %v741_v52 }
 0x693   :  { %2267 = vrcp.f32 %v661_v54 }
 0x69c   :  { %v2266_v16 = vpop.eup %2265 }
 0x69d   :  { %v2268_v56 = vpop.eup %2267  ;;  %v745_v59 = vmul.f32 %v2266_v16, %v2600_v5 }
 0x69e   :  { %v665_v61 = vmul.f32 %v2268_v56, %v2604_v9 }
 0x6fd   :  { %v748_v55 = vpop.permute.xlu0 %747 }
 0x6fe   :  { %v750_v46 = vmul.f32 %v2266_v16, %v748_v55 }
 0x700   :  { %752 = vrot.lane.b32.xlu0 %v750_v46, %s2389_s15 }
 0x701   :  { %v668_v57 = vpop.permute.xlu1 %667 }
 0x702   :  { %v670_v58 = vmul.f32 %v2268_v56, %v668_v57 }
 0x704   :  { %672 = vrot.lane.b32.xlu1 %v670_v58, %s2389_s15 }
 0x772   :  { %v753_v25 = vpop.permute.xlu0 %752 }
 0x773   :  { %v2640_v60 = vadd.f32 %v753_v25, %v745_v59 }
 0x775   :  { %2269 = vtanh.f32 %v2640_v60 }
 0x776   :  { %v673_v62 = vpop.permute.xlu1 %672 }
 0x777   :  { %v2644_v63 = vadd.f32 %v673_v62, %v665_v61 }
 0x779   :  { %2271 = vtanh.f32 %v2644_v63 }
 0x77f   :  { %v2270_v0 = vpop.eup %2269 }
 0x780   :  { %758 = vrot.lane.b32.xlu0 %v2270_v0, %s2388_s4 }
 0x783   :  { %v2272_v2 = vpop.eup %2271 }
 0x784   :  { %678 = vrot.lane.b32.xlu1 %v2272_v2, %s2388_s4 }
 0x7f2   :  { %v759_v4 = vpop.permute.xlu0 %758 }
 0x7f3   :  { %v2649_v5 = vmul.f32 %v2266_v16, %v759_v4 }
 0x7f5   :  { %v850_v6 = vpack.c.bf16 %v2649_v5, %v2649_v5 }
 0x7f6   :  { %v679_v8 = vpop.permute.xlu1 %678 }
 0x7f7   :  { %v2653_v10 = vmul.f32 %v2268_v56, %v679_v8  ;;  %852 = vrot.lane.b32.xlu0 %v850_v6, %s2389_s15 }
 0x7f9   :  { %v770_v9 = vpack.c.bf16 %v2653_v10, %v2653_v10 }
 0x7fb   :  { %772 = vrot.lane.b32.xlu1 %v770_v9, %s2389_s15 }
 0x869   :  { %v853_v11 = vpop.permute.xlu0 %852 }
 0x86a   :  { %2105 = vmatmul.mubr.msk.bf16.vlgmr.msra.gmra.mrb[28].mxu1 %vm87_vm1, %v853_v11 }
 0x86b   :  { %2117 = vmatpush3.bf16.msra.mxu1 %v2501_v12  ;;  %2120 = vmatprep.mubr.msk.bf16.mxu1 %vm2386_vm0, %v2385_v1 }
 0x86c   :  { %2118 = vmatprep.subr.bf16.mxu1 %v2385_v1 }
 0x86d   :  { %v773_v14 = vpop.permute.xlu1 %772 }
 0x86e   :  { %2097 = vmatmul.mubr.msk.bf16.vlgmr.msra.gmra.mrb[12].mxu0 %vm87_vm1, %v773_v14 }
 0x86f   :  { %2109 = vmatpush3.bf16.msra.mxu0 %v2457_v3  ;;  %2119 = vmatpush3.bf16.msra.mxu1 %v2509_v13 }
 0x870   :  { %2110 = vmatprep.subr.bf16.mxu0 %v2385_v1  ;;  %2112 = vmatprep.mubr.msk.bf16.mxu0 %vm2386_vm0, %v2385_v1 }
 0x871   :  { %2132 = vmatprep.subr.bf16.mxu1 %v2385_v1 }
 0x873   :  { %2111 = vmatpush3.bf16.msra.mxu0 %v2474_v7 }
 0x874   :  { %2124 = vmatprep.subr.bf16.mxu0 %v2385_v1 }
 0x93d   :  { %v891_v17 = vpop.f32.mrb[28].mxu1 }
 0x93e   :  { %v897_v18 = vadd.f32 %v891_v17, %v2553_v48  ;;  %v2106_v19 = vpop.f32.mrb[29].mxu1 }
 0x93f   :  { %v894_v21 = vpop.f32.mrb[30].mxu1 }
 0x940   :  { %2273 = vtanh.f32 %v897_v18  ;;  %v2107_v23 = vpop.f32.mrb[31].mxu1  ;;  %v1918_v39 = vmul.f32 -1.442695, %v897_v18 }
 0x941   :  { %v811_v26 = vpop.f32.mrb[12].mxu0 }
 0x942   :  { %v817_v27 = vadd.f32 %v811_v26, %v2528_v22  ;;  %v2098_v30 = vpop.f32.mrb[13].mxu0 }
 0x943   :  { %v814_v32 = vpop.f32.mrb[14].mxu0 }
 0x944   :  { %2275 = vtanh.f32 %v817_v27  ;;  %v2099_v34 = vpop.f32.mrb[15].mxu0  ;;  %v1916_v48 = vmul.f32 -1.442695, %v817_v27 }
 0x945   :  { %2277 = vpow2.f32 %v1918_v39 }
 0x946   :  { %2279 = vpow2.f32 %v1916_v48 }
 0x94a   :  { %v2274_v36 = vpop.eup %2273 }
 0x94b   :  { %907 = vrot.lane.b32.xlu0 %v2274_v36, %s2388_s4 }
 0x94e   :  { %v2276_v37 = vpop.eup %2275 }
 0x94f   :  { %827 = vrot.lane.b32.xlu1 %v2276_v37, %s2388_s4  ;;  %v2278_v41 = vpop.eup %2277 }
 0x950   :  { %v901_v43 = vadd.f32 1.0, %v2278_v41  ;;  %v2280_v45 = vpop.eup %2279 }
 0x951   :  { %v821_v47 = vadd.f32 1.0, %v2280_v45 }
 0x952   :  { %2281 = vrcp.f32 %v901_v43 }
 0x953   :  { %2283 = vrcp.f32 %v821_v47 }
 0x95c   :  { %v2282_v22 = vpop.eup %2281 }
 0x95d   :  { %v2284_v50 = vpop.eup %2283  ;;  %v905_v54 = vmul.f32 %v2282_v22, %v2640_v60 }
 0x95e   :  { %v825_v46 = vmul.f32 %v2284_v50, %v2644_v63 }
 0x9bd   :  { %v908_v49 = vpop.permute.xlu0 %907 }
 0x9be   :  { %v910_v51 = vmul.f32 %v2282_v22, %v908_v49 }
 0x9c0   :  { %912 = vrot.lane.b32.xlu0 %v910_v51, %s2389_s15 }
 0x9c1   :  { %v828_v52 = vpop.permute.xlu1 %827 }
 0x9c2   :  { %v830_v53 = vmul.f32 %v2284_v50, %v828_v52 }
 0x9c4   :  { %832 = vrot.lane.b32.xlu1 %v830_v53, %s2389_s15 }
 0xa32   :  { %v913_v16 = vpop.permute.xlu0 %912 }
 0xa33   :  { %v2680_v55 = vadd.f32 %v913_v16, %v905_v54 }
 0xa35   :  { %2285 = vtanh.f32 %v2680_v55 }
 0xa36   :  { %v833_v56 = vpop.permute.xlu1 %832 }
 0xa37   :  { %v2684_v57 = vadd.f32 %v833_v56, %v825_v46 }
 0xa39   :  { %2287 = vtanh.f32 %v2684_v57 }
 0xa3f   :  { %v2286_v58 = vpop.eup %2285 }
 0xa40   :  { %918 = vrot.lane.b32.xlu0 %v2286_v58, %s2388_s4 }
 0xa43   :  { %v2288_v59 = vpop.eup %2287 }
 0xa44   :  { %838 = vrot.lane.b32.xlu1 %v2288_v59, %s2388_s4 }
 0xab2   :  { %v919_v25 = vpop.permute.xlu0 %918 }
 0xab3   :  { %v2689_v60 = vmul.f32 %v2282_v22, %v919_v25 }
 0xab5   :  { %v1010_v61 = vpack.c.bf16 %v2689_v60, %v2689_v60 }
 0xab6   :  { %v839_v62 = vpop.permute.xlu1 %838 }
 0xab7   :  { %v2693_v0 = vmul.f32 %v2284_v50, %v839_v62  ;;  %1012 = vrot.lane.b32.xlu0 %v1010_v61, %s2389_s15 }
 0xab9   :  { %v930_v63 = vpack.c.bf16 %v2693_v0, %v2693_v0 }
 0xabb   :  { %932 = vrot.lane.b32.xlu1 %v930_v63, %s2389_s15 }
 0xb29   :  { %v1013_v2 = vpop.permute.xlu0 %1012 }
 0xb2a   :  { %2121 = vmatmul.mubr.msk.bf16.vlgmr.msra.gmra.mrb[32].mxu1 %vm87_vm1, %v1013_v2 }
 0xb2b   :  { %2133 = vmatpush3.bf16.msra.mxu1 %v2501_v12  ;;  %2136 = vmatprep.mubr.msk.bf16.mxu1 %vm2386_vm0, %v2385_v1 }
 0xb2c   :  { %2134 = vmatprep.subr.bf16.mxu1 %v2385_v1 }
 0xb2d   :  { %v933_v4 = vpop.permute.xlu1 %932 }
 0xb2e   :  { %2113 = vmatmul.mubr.msk.bf16.vlgmr.msra.gmra.mrb[16].mxu0 %vm87_vm1, %v933_v4 }
 0xb2f   :  { %2125 = vmatpush3.bf16.msra.mxu0 %v2457_v3  ;;  %2135 = vmatpush3.bf16.msra.mxu1 %v2509_v13 }
 0xb30   :  { %2126 = vmatprep.subr.bf16.mxu0 %v2385_v1  ;;  %2128 = vmatprep.mubr.msk.bf16.mxu0 %vm2386_vm0, %v2385_v1 }
 0xb31   :  { %2148 = vmatprep.subr.bf16.mxu1 %v2385_v1 }
 0xb33   :  { %2127 = vmatpush3.bf16.msra.mxu0 %v2474_v7 }
 0xb34   :  { %2140 = vmatprep.subr.bf16.mxu0 %v2385_v1 }
 0xbfd   :  { %v1051_v6 = vpop.f32.mrb[32].mxu1 }
 0xbfe   :  { %v1057_v8 = vadd.f32 %v1051_v6, %v2547_v42  ;;  %v2122_v9 = vpop.f32.mrb[33].mxu1 }
 0xbff   :  { %v1054_v11 = vpop.f32.mrb[34].mxu1 }
 0xc00   :  { %2289 = vtanh.f32 %v1057_v8  ;;  %v2123_v14 = vpop.f32.mrb[35].mxu1  ;;  %v1922_v30 = vmul.f32 -1.442695, %v1057_v8 }
 0xc01   :  { %v971_v17 = vpop.f32.mrb[16].mxu0 }
 0xc02   :  { %v977_v18 = vadd.f32 %v971_v17, %v2534_v31  ;;  %v2114_v19 = vpop.f32.mrb[17].mxu0 }
 0xc03   :  { %v974_v21 = vpop.f32.mrb[18].mxu0 }
 0xc04   :  { %2291 = vtanh.f32 %v977_v18  ;;  %v2115_v23 = vpop.f32.mrb[19].mxu0  ;;  %v1920_v42 = vmul.f32 -1.442695, %v977_v18 }
 0xc05   :  { %2293 = vpow2.f32 %v1922_v30 }
 0xc06   :  { %2295 = vpow2.f32 %v1920_v42 }
 0xc0a   :  { %v2290_v26 = vpop.eup %2289 }
 0xc0b   :  { %1067 = vrot.lane.b32.xlu0 %v2290_v26, %s2388_s4 }
 0xc0e   :  { %v2292_v27 = vpop.eup %2291 }
 0xc0f   :  { %987 = vrot.lane.b32.xlu1 %v2292_v27, %s2388_s4  ;;  %v2294_v32 = vpop.eup %2293 }
 0xc10   :  { %v1061_v34 = vadd.f32 1.0, %v2294_v32  ;;  %v2296_v36 = vpop.eup %2295 }
 0xc11   :  { %v981_v37 = vadd.f32 1.0, %v2296_v36 }
 0xc12   :  { %2297 = vrcp.f32 %v1061_v34 }
 0xc13   :  { %2299 = vrcp.f32 %v981_v37 }
 0xc1c   :  { %v2298_v31 = vpop.eup %2297 }
 0xc1d   :  { %v2300_v41 = vpop.eup %2299  ;;  %v1065_v47 = vmul.f32 %v2298_v31, %v2680_v55 }
 0xc1e   :  { %v985_v51 = vmul.f32 %v2300_v41, %v2684_v57 }
 0xc7d   :  { %v1068_v39 = vpop.permute.xlu0 %1067 }
 0xc7e   :  { %v1070_v48 = vmul.f32 %v2298_v31, %v1068_v39 }
 0xc80   :  { %1072 = vrot.lane.b32.xlu0 %v1070_v48, %s2389_s15 }
 0xc81   :  { %v988_v43 = vpop.permute.xlu1 %987 }
 0xc82   :  { %v990_v45 = vmul.f32 %v2300_v41, %v988_v43 }
 0xc84   :  { %992 = vrot.lane.b32.xlu1 %v990_v45, %s2389_s15 }
 0xcf2   :  { %v1073_v22 = vpop.permute.xlu0 %1072 }
 0xcf3   :  { %v2720_v49 = vadd.f32 %v1073_v22, %v1065_v47 }
 0xcf5   :  { %2301 = vtanh.f32 %v2720_v49 }
 0xcf6   :  { %v993_v50 = vpop.permute.xlu1 %992 }
 0xcf7   :  { %v2724_v52 = vadd.f32 %v993_v50, %v985_v51 }
 0xcf9   :  { %2303 = vtanh.f32 %v2724_v52 }
 0xcff   :  { %v2302_v53 = vpop.eup %2301 }
 0xd00   :  { %1078 = vrot.lane.b32.xlu0 %v2302_v53, %s2388_s4 }
 0xd03   :  { %v2304_v54 = vpop.eup %2303 }
 0xd04   :  { %998 = vrot.lane.b32.xlu1 %v2304_v54, %s2388_s4 }
 0xd72   :  { %v1079_v16 = vpop.permute.xlu0 %1078 }
 0xd73   :  { %v2729_v55 = vmul.f32 %v2298_v31, %v1079_v16 }
 0xd75   :  { %v1170_v46 = vpack.c.bf16 %v2729_v55, %v2729_v55 }
 0xd76   :  { %v999_v56 = vpop.permute.xlu1 %998 }
 0xd77   :  { %v2733_v58 = vmul.f32 %v2300_v41, %v999_v56  ;;  %1172 = vrot.lane.b32.xlu0 %v1170_v46, %s2389_s15 }
 0xd79   :  { %v1090_v57 = vpack.c.bf16 %v2733_v58, %v2733_v58 }
 0xd7b   :  { %1092 = vrot.lane.b32.xlu1 %v1090_v57, %s2389_s15 }
 0xde9   :  { %v1173_v59 = vpop.permute.xlu0 %1172 }
 0xdea   :  { %2137 = vmatmul.mubr.msk.bf16.vlgmr.msra.gmra.mrb[36].mxu1 %vm87_vm1, %v1173_v59 }
 0xdeb   :  { %2149 = vmatpush3.bf16.msra.mxu1 %v2501_v12  ;;  %2152 = vmatprep.mubr.msk.bf16.mxu1 %vm2386_vm0, %v2385_v1 }
 0xdec   :  { %2150 = vmatprep.subr.bf16.mxu1 %v2385_v1 }
 0xded   :  { %v1093_v25 = vpop.permute.xlu1 %1092 }
 0xdee   :  { %2129 = vmatmul.mubr.msk.bf16.vlgmr.msra.gmra.mrb[20].mxu0 %vm87_vm1, %v1093_v25 }
 0xdef   :  { %2141 = vmatpush3.bf16.msra.mxu0 %v2457_v3  ;;  %2151 = vmatpush3.bf16.msra.mxu1 %v2509_v13 }
 0xdf0   :  { %2142 = vmatprep.subr.bf16.mxu0 %v2385_v1  ;;  %2144 = vmatprep.mubr.msk.bf16.mxu0 %vm2386_vm0, %v2385_v1 }
 0xdf1   :  { %2164 = vmatprep.subr.bf16.mxu1 %v2385_v1 }
 0xdf3   :  { %2143 = vmatpush3.bf16.msra.mxu0 %v2474_v7 }
 0xdf4   :  { %2156 = vmatprep.subr.bf16.mxu0 %v2385_v1 }
 0xebd   :  { %v1211_v61 = vpop.f32.mrb[36].mxu1 }
 0xebe   :  { %v1217_v62 = vadd.f32 %v1211_v61, %v2543_v38  ;;  %v2138_v63 = vpop.f32.mrb[37].mxu1 }
 0xebf   :  { %v1214_v2 = vpop.f32.mrb[38].mxu1 }
 0xec0   :  { %2305 = vtanh.f32 %v1217_v62  ;;  %v2139_v4 = vpop.f32.mrb[39].mxu1  ;;  %v1926_v19 = vmul.f32 -1.442695, %v1217_v62 }
 0xec1   :  { %v1131_v6 = vpop.f32.mrb[20].mxu0 }
 0xec2   :  { %v1137_v8 = vadd.f32 %v1131_v6, %v2538_v35  ;;  %v2130_v9 = vpop.f32.mrb[21].mxu0 }
 0xec3   :  { %v1134_v11 = vpop.f32.mrb[22].mxu0 }
 0xec4   :  { %2307 = vtanh.f32 %v1137_v8  ;;  %v2131_v14 = vpop.f32.mrb[23].mxu0  ;;  %v1924_v38 = vmul.f32 -1.442695, %v1137_v8 }
 0xec5   :  { %2309 = vpow2.f32 %v1926_v19 }
 0xec6   :  { %2311 = vpow2.f32 %v1924_v38 }
 0xeca   :  { %v2306_v17 = vpop.eup %2305 }
 0xecb   :  { %1227 = vrot.lane.b32.xlu0 %v2306_v17, %s2388_s4 }
 0xece   :  { %v2308_v18 = vpop.eup %2307 }
 0xecf   :  { %1147 = vrot.lane.b32.xlu1 %v2308_v18, %s2388_s4  ;;  %v2310_v21 = vpop.eup %2309 }
 0xed0   :  { %v1221_v23 = vadd.f32 1.0, %v2310_v21  ;;  %v2312_v26 = vpop.eup %2311 }
 0xed1   :  { %v1141_v27 = vadd.f32 1.0, %v2312_v26 }
 0xed2   :  { %2313 = vrcp.f32 %v1221_v23 }
 0xed3   :  { %2315 = vrcp.f32 %v1141_v27 }
 0xedc   :  { %v2314_v35 = vpop.eup %2313 }
 0xedd   :  { %v2316_v32 = vpop.eup %2315  ;;  %v1225_v37 = vmul.f32 %v2314_v35, %v2720_v49 }
 0xede   :  { %v1145_v48 = vmul.f32 %v2316_v32, %v2724_v52 }
 0xf3d   :  { %v1228_v30 = vpop.permute.xlu0 %1227 }
 0xf3e   :  { %v1230_v42 = vmul.f32 %v2314_v35, %v1228_v30 }
 0xf40   :  { %1232 = vrot.lane.b32.xlu0 %v1230_v42, %s2389_s15 }
 0xf41   :  { %v1148_v34 = vpop.permute.xlu1 %1147 }
 0xf42   :  { %v1150_v36 = vmul.f32 %v2316_v32, %v1148_v34 }
 0xf44   :  { %1152 = vrot.lane.b32.xlu1 %v1150_v36, %s2389_s15 }
 0xfb2   :  { %v1233_v31 = vpop.permute.xlu0 %1232 }
 0xfb3   :  { %v2760_v39 = vadd.f32 %v1233_v31, %v1225_v37 }
 0xfb5   :  { %2317 = vtanh.f32 %v2760_v39 }
 0xfb6   :  { %v1153_v41 = vpop.permute.xlu1 %1152 }
 0xfb7   :  { %v2764_v43 = vadd.f32 %v1153_v41, %v1145_v48 }
 0xfb9   :  { %2319 = vtanh.f32 %v2764_v43 }
 0xfbf   :  { %v2318_v45 = vpop.eup %2317 }
 0xfc0   :  { %1238 = vrot.lane.b32.xlu0 %v2318_v45, %s2388_s4 }
 0xfc3   :  { %v2320_v47 = vpop.eup %2319 }
 0xfc4   :  { %1158 = vrot.lane.b32.xlu1 %v2320_v47, %s2388_s4 }
0x1032   :  { %v1239_v22 = vpop.permute.xlu0 %1238 }
0x1033   :  { %v2769_v49 = vmul.f32 %v2314_v35, %v1239_v22 }
0x1035   :  { %v1330_v51 = vpack.c.bf16 %v2769_v49, %v2769_v49 }
0x1036   :  { %v1159_v50 = vpop.permute.xlu1 %1158 }
0x1037   :  { %v2773_v53 = vmul.f32 %v2316_v32, %v1159_v50  ;;  %1332 = vrot.lane.b32.xlu0 %v1330_v51, %s2389_s15 }
0x1039   :  { %v1250_v52 = vpack.c.bf16 %v2773_v53, %v2773_v53 }
0x103b   :  { %1252 = vrot.lane.b32.xlu1 %v1250_v52, %s2389_s15 }
0x10a9   :  { %v1333_v54 = vpop.permute.xlu0 %1332 }
0x10aa   :  { %2153 = vmatmul.mubr.msk.bf16.vlgmr.msra.gmra.mrb[40].mxu1 %vm87_vm1, %v1333_v54 }
0x10ab   :  { %2165 = vmatpush3.bf16.msra.mxu1 %v2501_v12  ;;  %2168 = vmatprep.mubr.msk.bf16.mxu1 %vm2386_vm0, %v2385_v1 }
0x10ac   :  { %2166 = vmatprep.subr.bf16.mxu1 %v2385_v1 }
0x10ad   :  { %v1253_v16 = vpop.permute.xlu1 %1252 }
0x10ae   :  { %2145 = vmatmul.mubr.msk.bf16.vlgmr.msra.gmra.mrb[24].mxu0 %vm87_vm1, %v1253_v16 }
0x10af   :  { %2157 = vmatpush3.bf16.msra.mxu0 %v2457_v3  ;;  %2167 = vmatpush3.bf16.msra.mxu1 %v2509_v13 }
0x10b0   :  { %2158 = vmatprep.subr.bf16.mxu0 %v2385_v1  ;;  %2160 = vmatprep.mubr.msk.bf16.mxu0 %vm2386_vm0, %v2385_v1 }
0x10b3   :  { %2159 = vmatpush3.bf16.msra.mxu0 %v2474_v7 }
0x117d   :  { %v1371_v12 = vpop.f32.mrb[40].mxu1 }
0x117e   :  { %v1377_v46 = vadd.f32 %v1371_v12, %v2549_v44  ;;  %v2154_v56 = vpop.f32.mrb[41].mxu1 }
0x117f   :  { %v1374_v57 = vpop.f32.mrb[42].mxu1 }
0x1180   :  { %2321 = vtanh.f32 %v1377_v46  ;;  %v2155_v59 = vpop.f32.mrb[43].mxu1  ;;  %v1930_v7 = vmul.f32 -1.442695, %v1377_v46 }
0x1181   :  { %v1291_v25 = vpop.f32.mrb[24].mxu0 }
0x1182   :  { %v1297_v61 = vadd.f32 %v1291_v25, %v2532_v29  ;;  %v2146_v3 = vpop.f32.mrb[25].mxu0 }
0x1183   :  { %v1294_v62 = vpop.f32.mrb[26].mxu0 }
0x1184   :  { %2323 = vtanh.f32 %v1297_v61  ;;  %v2147_v13 = vpop.f32.mrb[27].mxu0  ;;  %v1928_v44 = vmul.f32 -1.442695, %v1297_v61 }
0x1185   :  { %2325 = vpow2.f32 %v1930_v7 }
0x1186   :  { %2327 = vpow2.f32 %v1928_v44 }
0x118a   :  { %v2322_v63 = vpop.eup %2321 }
0x118b   :  { %1387 = vrot.lane.b32.xlu0 %v2322_v63, %s2388_s4 }
0x118e   :  { %v2324_v1 = vpop.eup %2323 }
0x118f   :  { %1307 = vrot.lane.b32.xlu1 %v2324_v1, %s2388_s4  ;;  %v2326_v2 = vpop.eup %2325 }
0x1190   :  { %v1381_v4 = vadd.f32 1.0, %v2326_v2  ;;  %v2328_v6 = vpop.eup %2327 }
0x1191   :  { %v1301_v8 = vadd.f32 1.0, %v2328_v6 }
0x1192   :  { %2329 = vrcp.f32 %v1381_v4 }
0x1193   :  { %2331 = vrcp.f32 %v1301_v8 }
0x119c   :  { %v2330_v29 = vpop.eup %2329 }
0x119d   :  { %v2332_v14 = vpop.eup %2331  ;;  %v1385_v19 = vmul.f32 %v2330_v29, %v2760_v39 }
0x119e   :  { %v1305_v23 = vmul.f32 %v2332_v14, %v2764_v43 }
0x11fd   :  { %v1388_v9 = vpop.permute.xlu0 %1387 }
0x11fe   :  { %v1390_v11 = vmul.f32 %v2330_v29, %v1388_v9 }
0x1200   :  { %1392 = vrot.lane.b32.xlu0 %v1390_v11, %s2389_s15 }
0x1201   :  { %v1308_v17 = vpop.permute.xlu1 %1307 }
0x1202   :  { %v1310_v18 = vmul.f32 %v2332_v14, %v1308_v17 }
0x1204   :  { %1312 = vrot.lane.b32.xlu1 %v1310_v18, %s2389_s15 }
0x1272   :  { %v1393_v38 = vpop.permute.xlu0 %1392 }
0x1273   :  { %v1395_v21 = vadd.f32 %v1393_v38, %v1385_v19 }
0x1275   :  { %2333 = vtanh.f32 %v1395_v21 }
0x1276   :  { %v1313_v26 = vpop.permute.xlu1 %1312 }
0x1277   :  { %v1315_v27 = vadd.f32 %v1313_v26, %v1305_v23 }
0x1279   :  { %2335 = vtanh.f32 %v1315_v27 }
0x127f   :  { %v2334_v35 = vpop.eup %2333 }
0x1280   :  { %1398 = vrot.lane.b32.xlu0 %v2334_v35, %s2388_s4 }
0x1283   :  { %v2336_v30 = vpop.eup %2335 }
0x1284   :  { %1318 = vrot.lane.b32.xlu1 %v2336_v30, %s2388_s4 }
0x12f2   :  { %v1399_v42 = vpop.permute.xlu0 %1398 }
0x12f3   :  { %v1401_v32 = vmul.f32 %v2330_v29, %v1399_v42 }
0x12f5   :  { %v1489_v34 = vpack.c.bf16 %v1401_v32, %v1401_v32 }
0x12f6   :  { %v1319_v36 = vpop.permute.xlu1 %1318 }
0x12f7   :  { %v1321_v37 = vmul.f32 %v2332_v14, %v1319_v36  ;;  %1491 = vrot.lane.b32.xlu0 %v1489_v34, %s2389_s15 }
0x12f9   :  { %v1410_v31 = vpack.c.bf16 %v1321_v37, %v1321_v37 }
0x12fb   :  { %1412 = vrot.lane.b32.xlu1 %v1410_v31, %s2389_s15 }
0x1369   :  { %v1492_v39 = vpop.permute.xlu0 %1491 }
0x136a   :  { %2169 = vmatmul.mubr.msk.bf16.vlgmr.msra.gmra.mrb[44].mxu1 %vm87_vm1, %v1492_v39 }
0x136d   :  { %v1413_v48 = vpop.permute.xlu1 %1412 }
0x136e   :  { %2161 = vmatmul.mubr.msk.bf16.vlgmr.msra.gmra.mrb[28].mxu0 %vm87_vm1, %v1413_v48 }
0x143d   :  { %v1530_v41 = vpop.f32.mrb[44].mxu1 }
0x143e   :  { %v1536_v43 = vadd.f32 %v1530_v41, %v2545_v40  ;;  %v2170_v45 = vpop.f32.mrb[45].mxu1 }
0x143f   :  { %v1533_v47 = vpop.f32.mrb[46].mxu1 }
0x1440   :  { %2337 = vtanh.f32 %v1536_v43  ;;  %v2171_v22 = vpop.f32.mrb[47].mxu1  ;;  %v1934_v56 = vmul.f32 -1.442695, %v1536_v43 }
0x1441   :  { %v1451_v51 = vpop.f32.mrb[28].mxu0 }
0x1442   :  { %v1457_v50 = vadd.f32 %v1451_v51, %v2536_v33  ;;  %v2162_v52 = vpop.f32.mrb[29].mxu0 }
0x1443   :  { %v1454_v54 = vpop.f32.mrb[30].mxu0 }
0x1444   :  { %2339 = vtanh.f32 %v1457_v50  ;;  %v2163_v16 = vpop.f32.mrb[31].mxu0  ;;  %v1932_v40 = vmul.f32 -1.442695, %v1457_v50 }
0x1445   :  { %2341 = vpow2.f32 %v1934_v56 }
0x1446   :  { %2343 = vpow2.f32 %v1932_v40 }
0x144a   :  { %v2338_v12 = vpop.eup %2337 }
0x144b   :  { %1546 = vrot.lane.b32.xlu0 %v2338_v12, %s2388_s4 }
0x144e   :  { %v2340_v46 = vpop.eup %2339 }
0x144f   :  { %1467 = vrot.lane.b32.xlu1 %v2340_v46, %s2388_s4  ;;  %v2342_v57 = vpop.eup %2341 }
0x1450   :  { %v1540_v59 = vadd.f32 1.0, %v2342_v57  ;;  %v2344_v25 = vpop.eup %2343 }
0x1451   :  { %v1461_v61 = vadd.f32 1.0, %v2344_v25  ;;  %v1947_v25 = vld [vmem:[%s2945_s9] ss:$0 sm:$0xff] }
0x1452   :  { %2345 = vrcp.f32 %v1540_v59 }
0x1453   :  { %2347 = vrcp.f32 %v1461_v61 }
0x145c   :  { %v2346_v33 = vpop.eup %2345 }
0x145d   :  { %v2348_v13 = vpop.eup %2347  ;;  %v1544_v7 = vmul.f32 %v2346_v33, %v1395_v21 }
0x145e   :  { %v1465_v4 = vmul.f32 %v2348_v13, %v1315_v27 }
0x14bd   :  { %v1547_v3 = vpop.permute.xlu0 %1546 }
0x14be   :  { %v1549_v62 = vmul.f32 %v2346_v33, %v1547_v3 }
0x14c0   :  { %1551 = vrot.lane.b32.xlu0 %v1549_v62, %s2389_s15 }
0x14c1   :  { %v1468_v63 = vpop.permute.xlu1 %1467 }
0x14c2   :  { %v1470_v1 = vmul.f32 %v2348_v13, %v1468_v63 }
0x14c4   :  { %1472 = vrot.lane.b32.xlu1 %v1470_v1, %s2389_s15 }
0x1532   :  { %v1552_v44 = vpop.permute.xlu0 %1551 }
0x1533   :  { %v1554_v2 = vadd.f32 %v1552_v44, %v1544_v7 }
0x1535   :  { %2349 = vtanh.f32 %v1554_v2 }
0x1536   :  { %v1473_v6 = vpop.permute.xlu1 %1472 }
0x1537   :  { %v1475_v8 = vadd.f32 %v1473_v6, %v1465_v4 }
0x1539   :  { %2351 = vtanh.f32 %v1475_v8 }
0x153f   :  { %v2350_v29 = vpop.eup %2349 }
0x1540   :  { %1557 = vrot.lane.b32.xlu0 %v2350_v29, %s2388_s4 }
0x1543   :  { %v2352_v9 = vpop.eup %2351 }
0x1544   :  { %1403 = vrot.lane.b32.xlu0 %v1401_v32, %s2389_s15  ;;  %1478 = vrot.lane.b32.xlu1 %v2352_v9, %s2388_s4  ;;  %v2224_v32 = vld [vmem:[%s2944_s7 + $0x8] sm:$0xff]  }
0x1548   :  { %1083 = vrot.lane.b32.xlu0 %v2729_v55, %s2389_s15  ;;  %v2221_v55 = vld [vmem:[%s2943_s8] sm:$0xff]  }
0x1549   :  { %2172 = vmatprep.subr.bf16.mxu0 %v2221_v55 }
0x154a   :  { %2173 = vmatpush3.bf16.msra.mxu0 %v2221_v55 }
0x154c   :  { %763 = vrot.lane.b32.xlu0 %v2649_v5, %s2389_s15 }
0x1550   :  { %443 = vrot.lane.b32.xlu0 %v2569_v24, %s2389_s15  ;;  %v2222_v24 = vld [vmem:[%s2943_s8 + $0x8] sm:$0xff]  }
0x1551   :  { %2174 = vmatprep.subr.bf16.mxu0 %v2222_v24 }
0x1552   :  { %2175 = vmatpush3.bf16.msra.mxu0 %v2222_v24 }
0x1554   :  { %359 = vrot.lane.b32.xlu0 %v2573_v28, %s2389_s15 }
0x1558   :  { %683 = vrot.lane.b32.xlu0 %v2653_v10, %s2389_s15 }
0x155c   :  { %1003 = vrot.lane.b32.xlu0 %v2733_v58, %s2389_s15  ;;  %v2223_v58 = vld [vmem:[%s2944_s7] sm:$0xff]  }
0x155d   :  { %2184 = vmatprep.subr.bf16.mxu0 %v2223_v58 }
0x1560   :  { %1323 = vrot.lane.b32.xlu0 %v1321_v37, %s2389_s15 }
0x15b2   :  { %v1558_v5 = vpop.permute.xlu0 %1557 }
0x15b3   :  { %v1560_v28 = vmul.f32 %v2346_v33, %v1558_v5 }
0x15b5   :  { %1562 = vrot.lane.b32.xlu1 %v1560_v28, %s2389_s15 }
0x15b6   :  { %v1404_v10 = vpop.permute.xlu0 %1403 }
0x15b7   :  { %1407 = vst.msk [vmem:[#allocation5 + $0x8] sm:$0xff] %vm87_vm1, %v1404_v10 }
0x15b9   :  { %1243 = vrot.lane.b32.xlu1 %v2769_v49, %s2389_s15 }
0x15ba   :  { %v1084_v11 = vpop.permute.xlu0 %1083 }
0x15bb   :  { %1087 = vst.msk [vmem:[#allocation5 + $0x18] sm:$0xff] %vm87_vm1, %v1084_v11 }
0x15bd   :  { %923 = vrot.lane.b32.xlu1 %v2689_v60, %s2389_s15  ;;  %v1479_v60 = vpop.permute.xlu1 %1478 }
0x15be   :  { %v764_v14 = vpop.permute.xlu0 %763  ;;  %v1481_v19 = vmul.f32 %v2348_v13, %v1479_v60  ;;  %v1583_v26 = vld [vmem:[#allocation5 + $0x8] sm:$0xff] }
0x15bf   :  { %767 = vst.msk [vmem:[#allocation5 + $0x28] sm:$0xff] %vm87_vm1, %v764_v14 }
0x15c1   :  { %603 = vrot.lane.b32.xlu1 %v2609_v15, %s2389_s15 }
0x15c2   :  { %v444_v17 = vpop.permute.xlu0 %443  ;;  %v1585_v30 = vld [vmem:[#allocation5 + $0x18] sm:$0xff] }
0x15c3   :  { %447 = vst.msk [vmem:[#allocation5 + $0x38] sm:$0xff] %vm87_vm1, %v444_v17 }
0x15c5   :  { %523 = vrot.lane.b32.xlu1 %v2613_v20, %s2389_s15 }
0x15c6   :  { %v360_v49 = vpop.permute.xlu0 %359  ;;  %v1587_v37 = vld [vmem:[#allocation5 + $0x28] sm:$0xff] }
0x15c7   :  { %362 = vst.msk [vmem:[#allocation4] sm:$0xff] %vm87_vm1, %v360_v49 }
0x15c9   :  { %843 = vrot.lane.b32.xlu1 %v2693_v0, %s2389_s15 }
0x15ca   :  { %v684_v18 = vpop.permute.xlu0 %683  ;;  %v1589_v41 = vld [vmem:[#allocation5 + $0x38] sm:$0xff] }
0x15cb   :  { %687 = vst.msk [vmem:[#allocation4 + $0x10] sm:$0xff] %vm87_vm1, %v684_v18 }
0x15cd   :  { %1163 = vrot.lane.b32.xlu1 %v2773_v53, %s2389_s15 }
0x15ce   :  { %v1004_v15 = vpop.permute.xlu0 %1003  ;;  %v1566_v47 = vld [vmem:[#allocation4] sm:$0xff] }
0x15cf   :  { %1007 = vst.msk [vmem:[#allocation4 + $0x20] sm:$0xff] %vm87_vm1, %v1004_v15 }
0x15d1   :  { %1483 = vrot.lane.b32.xlu1 %v1481_v19, %s2389_s15 }
0x15d2   :  { %v1324_v20 = vpop.permute.xlu0 %1323  ;;  %v1568_v52 = vld [vmem:[#allocation4 + $0x10] sm:$0xff] }
0x15d3   :  { %1327 = vst.msk [vmem:[#allocation4 + $0x30] sm:$0xff] %vm87_vm1, %v1324_v20 }
0x15d6   :  { %v1570_v12 = vld [vmem:[#allocation4 + $0x20] sm:$0xff] }
0x15da   :  { %v1572_v40 = vld [vmem:[#allocation4 + $0x30] sm:$0xff] }
0x1627   :  { %v1563_v38 = vpop.permute.xlu1 %1562 }
0x1628   :  { %1565 = vst.msk [vmem:[#allocation5] sm:$0xff] %vm87_vm1, %v1563_v38 }
0x162b   :  { %v1244_v0 = vpop.permute.xlu1 %1243 }
0x162c   :  { %1247 = vst.msk [vmem:[#allocation5 + $0x10] sm:$0xff] %vm87_vm1, %v1244_v0 }
0x162f   :  { %v924_v21 = vpop.permute.xlu1 %923  ;;  %v1582_v23 = vld [vmem:[#allocation5] sm:$0xff] }
0x1630   :  { %927 = vst.msk [vmem:[#allocation5 + $0x20] sm:$0xff] %vm87_vm1, %v924_v21  ;;  %v1590_v53 = vpack.c.bf16 %v1583_v26, %v1582_v23 }
0x1632   :  { %2176 = vmatprep.mubr.msk.bf16.mxu0 %vm87_vm1, %v1590_v53 }
0x1633   :  { %v604_v27 = vpop.permute.xlu1 %603  ;;  %v1584_v35 = vld [vmem:[#allocation5 + $0x10] sm:$0xff] }
0x1634   :  { %607 = vst.msk [vmem:[#allocation5 + $0x30] sm:$0xff] %vm87_vm1, %v604_v27  ;;  %v1591_v42 = vpack.c.bf16 %v1585_v30, %v1584_v35 }
0x1636   :  { %2177 = vmatmul.mubr.msk.bf16.vlgmr.msra.gmra.mrb[32].mxu0 %vm87_vm1, %v1591_v42 }
0x1637   :  { %2185 = vmatpush3.bf16.msra.mxu0 %v2223_v58  ;;  %v524_v34 = vpop.permute.xlu1 %523  ;;  %v1586_v36 = vld [vmem:[#allocation5 + $0x20] sm:$0xff] }
0x1638   :  { %527 = vst.msk [vmem:[#allocation4 + $0x8] sm:$0xff] %vm87_vm1, %v524_v34  ;;  %v1592_v31 = vpack.c.bf16 %v1587_v37, %v1586_v36  ;;  %2186 = vmatprep.subr.bf16.mxu0 %v2224_v32 }
0x163a   :  { %2180 = vmatprep.mubr.msk.bf16.mxu0 %vm87_vm1, %v1592_v31 }
0x163b   :  { %v844_v39 = vpop.permute.xlu1 %843  ;;  %v1588_v48 = vld [vmem:[#allocation5 + $0x30] sm:$0xff]  ;;  %2187 = vmatpush3.bf16.msra.mxu0 %v2224_v32 }
0x163c   :  { %847 = vst.msk [vmem:[#allocation4 + $0x18] sm:$0xff] %vm87_vm1, %v844_v39  ;;  %v1593_v43 = vpack.c.bf16 %v1589_v41, %v1588_v48 }
0x163e   :  { %2181 = vmatmul.mubr.msk.bf16.gmra.mrb[36].mxu0 %vm87_vm1, %v1593_v43 }
0x163f   :  { %v1164_v45 = vpop.permute.xlu1 %1163  ;;  %v1567_v22 = vld [vmem:[#allocation4 + $0x8] sm:$0xff] }
0x1640   :  { %1167 = vst.msk [vmem:[#allocation4 + $0x28] sm:$0xff] %vm87_vm1, %v1164_v45  ;;  %v1574_v51 = vpack.c.bf16 %v1567_v22, %v1566_v47 }
0x1642   :  { %2188 = vmatprep.mubr.msk.bf16.mxu0 %vm87_vm1, %v1574_v51 }
0x1643   :  { %v1484_v50 = vpop.permute.xlu1 %1483  ;;  %v1569_v54 = vld [vmem:[#allocation4 + $0x18] sm:$0xff] }
0x1644   :  { %1487 = vst.msk [vmem:[#allocation4 + $0x38] sm:$0xff] %vm87_vm1, %v1484_v50  ;;  %v1575_v16 = vpack.c.bf16 %v1569_v54, %v1568_v52 }
0x1646   :  { %2189 = vmatmul.mubr.msk.bf16.vlgmr.msra.gmra.mrb[32].mxu0 %vm87_vm1, %v1575_v16 }
0x1647   :  { %v1571_v46 = vld [vmem:[#allocation4 + $0x28] sm:$0xff] }
0x1648   :  { %v1576_v56 = vpack.c.bf16 %v1571_v46, %v1570_v12 }
0x164a   :  { %2192 = vmatprep.mubr.msk.bf16.mxu0 %vm87_vm1, %v1576_v56 }
0x164b   :  { %v1573_v57 = vld [vmem:[#allocation4 + $0x38] sm:$0xff] }
0x164c   :  { %v1577_v59 = vpack.c.bf16 %v1573_v57, %v1572_v40 }
0x164e   :  { %2193 = vmatmul.mubr.msk.bf16.gmra.mrb[36].mxu0 %vm87_vm1, %v1577_v59 }
0x1719   :  { %v2190_v61 = vpop.f32.mrb[32].mxu0 }
0x171a   :  { %v1785_v33 = vadd.f32 %v2190_v61, %v1947_v25  ;;  %v1745_v3 = vpop.f32.mrb[33].mxu0 }
0x171b   :  { %v2191_v62 = vpop.f32.mrb[34].mxu0  ;;  %v1783_v1 = vadd.f32 %v1947_v25, %v1745_v3 }
0x171c   :  { %1795 = vmax.xlane.f32.xlu0 %v1785_v33  ;;  %v1748_v13 = vpop.f32.mrb[35].mxu0  ;;  %v1786_v44 = vadd.f32 %v2191_v62, %v1947_v25 }
0x171d   :  { %v1784_v63 = vadd.f32 %v1947_v25, %v1748_v13 }
0x171f   :  { %1793 = vmax.xlane.f32.xlu1 %v1784_v63 }
0x1720   :  { %1791 = vmax.xlane.f32.xlu0 %v1783_v1 }
0x1721   :  { %v2194_v7 = vpop.f32.mrb[36].mxu0 }
0x1722   :  { %v1761_v2 = vpop.f32.mrb[37].mxu0  ;;  %v1789_v9 = vadd.f32 %v2194_v7, %v1947_v25 }
0x1723   :  { %v1787_v4 = vadd.f32 %v1947_v25, %v1761_v2  ;;  %v2195_v6 = vpop.f32.mrb[38].mxu0 }
0x1724   :  { %1797 = vmax.xlane.f32.xlu0 %v1786_v44  ;;  %v1764_v8 = vpop.f32.mrb[39].mxu0  ;;  %v1790_v55 = vadd.f32 %v2195_v6, %v1947_v25 }
0x1725   :  { %v1788_v29 = vadd.f32 %v1947_v25, %v1764_v8  ;;  %1799 = vmax.xlane.f32.xlu1 %v1787_v4 }
0x1728   :  { %1801 = vmax.xlane.f32.xlu0 %v1788_v29 }
0x1729   :  { %1803 = vmax.xlane.f32.xlu1 %v1789_v9 }
0x172c   :  { %1805 = vmax.xlane.f32.xlu0 %v1790_v55 }
0x17a9   :  { %v1796_v24 = vpop.xlane.xlu0 %1795 }
0x17aa   :  { %v2880_v5 = vsub.f32 %v1785_v33, %v1796_v24 }
0x17ac   :  { %v1819_v28 = vmul.f32 1.442695, %v2880_v5  ;;  %v1794_v58 = vpop.xlane.xlu1 %1793 }
0x17ad   :  { %v1792_v10 = vpop.xlane.xlu0 %1791  ;;  %v2886_v49 = vsub.f32 %v1784_v63, %v1794_v58 }
0x17ae   :  { %2353 = vpow2.f32 %v1819_v28  ;;  %v2883_v11 = vsub.f32 %v1783_v1, %v1792_v10 }
0x17af   :  { %v1817_v0 = vmul.f32 1.442695, %v2886_v49 }
0x17b0   :  { %v1815_v14 = vmul.f32 1.442695, %v2883_v11 }
0x17b1   :  { %v1798_v17 = vpop.xlane.xlu0 %1797 }
0x17b2   :  { %2355 = vpow2.f32 %v1815_v14  ;;  %v2888_v18 = vsub.f32 %v1786_v44, %v1798_v17  ;;  %v1800_v60 = vpop.xlane.xlu1 %1799 }
0x17b3   :  { %v2890_v15 = vsub.f32 %v1787_v4, %v1800_v60 }
0x17b4   :  { %v1821_v19 = vmul.f32 1.442695, %v2888_v18 }
0x17b5   :  { %v1823_v20 = vmul.f32 1.442695, %v2890_v15  ;;  %v1802_v38 = vpop.xlane.xlu0 %1801 }
0x17b6   :  { %2357 = vpow2.f32 %v1821_v19  ;;  %v2895_v21 = vsub.f32 %v1788_v29, %v1802_v38  ;;  %v1804_v23 = vpop.xlane.xlu1 %1803 }
0x17b7   :  { %2359 = vpow2.f32 %v1823_v20  ;;  %v2897_v26 = vsub.f32 %v1789_v9, %v1804_v23 }
0x17b8   :  { %v2354_v53 = vpop.eup %2353  ;;  %2361 = vpow2.f32 %v1817_v0  ;;  %v1825_v30 = vmul.f32 1.442695, %v2895_v21 }
0x17b9   :  { %v1827_v27 = vmul.f32 1.442695, %v2897_v26  ;;  %1835 = vadd.xlane.f32.xlu1 %v2354_v53  ;;  %v1806_v35 = vpop.xlane.xlu0 %1805 }
0x17ba   :  { %v2901_v42 = vsub.f32 %v1790_v55, %v1806_v35 }
0x17bb   :  { %2363 = vpow2.f32 %v1827_v27 }
0x17bc   :  { %v2356_v32 = vpop.eup %2355  ;;  %2365 = vpow2.f32 %v1825_v30  ;;  %v1829_v34 = vmul.f32 1.442695, %v2901_v42 }
0x17bd   :  { %1831 = vadd.xlane.f32.xlu1 %v2356_v32 }
0x17be   :  { %2367 = vpow2.f32 %v1829_v34 }
0x17c0   :  { %v2358_v36 = vpop.eup %2357 }
0x17c1   :  { %v2360_v37 = vpop.eup %2359  ;;  %1837 = vadd.xlane.f32.xlu0 %v2358_v36 }
0x17c2   :  { %1839 = vadd.xlane.f32.xlu1 %v2360_v37  ;;  %v2362_v31 = vpop.eup %2361 }
0x17c5   :  { %v2364_v39 = vpop.eup %2363  ;;  %1833 = vadd.xlane.f32.xlu0 %v2362_v31 }
0x17c6   :  { %1843 = vadd.xlane.f32.xlu1 %v2364_v39  ;;  %v2366_v48 = vpop.eup %2365 }
0x17c8   :  { %v2368_v41 = vpop.eup %2367 }
0x17c9   :  { %1841 = vadd.xlane.f32.xlu0 %v2366_v48 }
0x17cd   :  { %1845 = vadd.xlane.f32.xlu0 %v2368_v41 }
0x1846   :  { %v1836_v43 = vpop.xlane.xlu1 %1835 }
0x1847   :  { %2369 = vlog2.f32 %v1836_v43 }
0x184a   :  { %v1832_v45 = vpop.xlane.xlu1 %1831 }
0x184b   :  { %2371 = vlog2.f32 %v1832_v45 }
0x184e   :  { %v1838_v47 = vpop.xlane.xlu0 %1837 }
0x184f   :  { %2373 = vlog2.f32 %v1838_v47  ;;  %v1840_v22 = vpop.xlane.xlu1 %1839 }
0x1850   :  { %2375 = vlog2.f32 %v1840_v22 }
0x1851   :  { %v2370_v51 = vpop.eup %2369 }
0x1852   :  { %v1852_v50 = vmul.f32 0.6931472, %v2370_v51  ;;  %v1834_v52 = vpop.xlane.xlu0 %1833 }
0x1853   :  { %2377 = vlog2.f32 %v1834_v52  ;;  %v1844_v54 = vpop.xlane.xlu1 %1843 }
0x1854   :  { %v1865_v16 = vsub.f32 %v2880_v5, %v1852_v50  ;;  %2379 = vlog2.f32 %v1844_v54 }
0x1855   :  { %v2372_v12 = vpop.eup %2371 }
0x1856   :  { %1873 = vst [vmem:[%s2946_s10 + $0x10] sm:$0xff] %v1865_v16  ;;  %v1848_v46 = vmul.f32 0.6931472, %v2372_v12  ;;  %v1842_v56 = vpop.xlane.xlu0 %1841 }
0x1857   :  { %2381 = vlog2.f32 %v1842_v56 }
0x1858   :  { %v1863_v40 = vsub.f32 %v2883_v11, %v1848_v46 }
0x1859   :  { %v2374_v57 = vpop.eup %2373 }
0x185a   :  { %v2376_v59 = vpop.eup %2375  ;;  %1871 = vst [vmem:[%s2946_s10] sm:$0xff] %v1863_v40  ;;  %v1854_v25 = vmul.f32 0.6931472, %v2374_v57  ;;  %v1846_v61 = vpop.xlane.xlu0 %1845 }
0x185b   :  { %v1856_v33 = vmul.f32 0.6931472, %v2376_v59  ;;  %2383 = vlog2.f32 %v1846_v61 }
0x185c   :  { %v1866_v3 = vsub.f32 %v2888_v18, %v1854_v25 }
0x185d   :  { %v2378_v62 = vpop.eup %2377  ;;  %v1867_v13 = vsub.f32 %v2890_v15, %v1856_v33 }
0x185e   :  { %v2380_v63 = vpop.eup %2379  ;;  %1874 = vst [vmem:[%s2946_s10 + $0x18] sm:$0xff] %v1866_v3  ;;  %v1850_v1 = vmul.f32 0.6931472, %v2378_v62 }
0x185f   :  { %1875 = vst [vmem:[%s2946_s10 + $0x20] sm:$0xff] %v1867_v13  ;;  %v1860_v7 = vmul.f32 0.6931472, %v2380_v63 }
0x1860   :  { %v1864_v44 = vsub.f32 %v2886_v49, %v1850_v1 }
0x1861   :  { %v2382_v2 = vpop.eup %2381  ;;  %v1869_v4 = vsub.f32 %v2897_v26, %v1860_v7 }
0x1862   :  { %1872 = vst [vmem:[%s2946_s10 + $0x8] sm:$0xff] %v1864_v44  ;;  %v1858_v6 = vmul.f32 0.6931472, %v2382_v2 }
0x1863   :  { %1877 = vst [vmem:[%s2946_s10 + $0x30] sm:$0xff] %v1869_v4 }
0x1864   :  { %v1868_v8 = vsub.f32 %v2895_v21, %v1858_v6 }
0x1865   :  { %v2384_v29 = vpop.eup %2383 }
0x1866   :  { %1876 = vst [vmem:[%s2946_s10 + $0x28] sm:$0xff] %v1868_v8  ;;  %v1862_v9 = vmul.f32 0.6931472, %v2384_v29 }
0x1868   :  { %v1870_v55 = vsub.f32 %v2901_v42, %v1862_v9 }
0x186a   :  { %1878 = vst [vmem:[%s2946_s10 + $0x38] sm:$0xff] %v1870_v55 }

</bundles_post_ra>
